<compile_context>
chip_gen: v7x
topology: tpu7x:2x2x1
jax: 0.10.0
libtpu: 0.0.40
codegen_flags: <defaults>
</compile_context>

<pallas_src>
import functools

import jax
import jax.numpy as jnp
from jax.experimental import pallas as pl
from jax.experimental.pallas import tpu as pltpu


_NEG_BIG = -1e30  # bias for padded head lanes -> exp() underflows to exactly 0


def _round_up(x, m):
    return ((x + m - 1) // m) * m


def _mlp_softmax_kernel(xs_ref, xo_ref, w1_ref, b1_ref,
                        w2_ref, b2_ref, w3_ref, b3_ref, o_ref):
    # In-VMEM concat of the two input halves, then one fc1 matmul over the
    # full K = nb_states + nb_obs (single MXU weight load / result drain).
    x = jnp.concatenate([xs_ref[...], xo_ref[...]], axis=1).astype(jnp.bfloat16)

    # fc1 + ReLU; MXU takes bf16 operands, accumulates f32; epilogue in f32.
    h1 = jnp.dot(x, w1_ref[...], preferred_element_type=jnp.float32) + b1_ref[...]
    h1 = jnp.maximum(h1, 0.0)

    # fc2 + ReLU
    h2 = jnp.dot(h1.astype(jnp.bfloat16), w2_ref[...],
                 preferred_element_type=jnp.float32) + b2_ref[...]
    h2 = jnp.maximum(h2, 0.0)

    # fc_head (lane-padded): padded columns have zero weight and -1e30 bias.
    logits = jnp.dot(h2.astype(jnp.bfloat16), w3_ref[...],
                     preferred_element_type=jnp.float32) + b3_ref[...]

    # Numerically stable softmax over the (padded) last dim; padded lanes -> 0.
    m = jnp.max(logits, axis=-1, keepdims=True)
    e = jnp.exp(logits - m)
    denom = jnp.sum(e, axis=-1, keepdims=True)
    o_ref[...] = (e * pl.reciprocal(denom, approx=True)).astype(o_ref.dtype)


@functools.partial(jax.jit, static_argnames=("out_dim", "tm", "return_padded"))
def agent_actor_binary_forward(xs, xo, params, out_dim, tm=1024,
                               return_padded=False):
    """Pallas implementation of agentActor_binary.forward(xs, xo).

    `params` is the tuple from init_params (bf16 weights with the head padded
    to a lane-dense multiple-of-128 width; f32 biases). Inputs may be f32 or
    bf16 (no wrapper-side cast is added either way).

    `return_padded=True` returns the lane-dense (B, head_dim) slab directly
    (columns >= out_dim are exactly 0) and skips the post-kernel slice, which
    is a separate HBM round trip; prefer it when the consumer can slice/fuse.
    """
    # TODO(synk): torch-side `if (xs != xs).any(): print('Error: NaN')` is a
    # host-side print with no kernel equivalent; skipped.
    w1, b1, w2, b2, w3, b3 = params

    B = xs.shape[0]
    nb_states = xs.shape[1]
    nb_obs = xo.shape[1]
    head_dim = w3.shape[1]  # lane-padded output width (multiple of 128)

    # Batch tile: per-step compute is tiny while per-grid-step fixed cost is
    # ~0.35 us, so use the biggest tile that fits (VMEM is not a constraint at
    # these layer sizes even on v7x's 64 MiB). For B <= 2*tm, split into (at
    # least) two blocks so the "parallel" grid uses both v7x TensorCores; the
    # one extra step is negligible on single-TC chips (v5e/v6e).
    tm_cap = max(8, tm)
    if 16 <= B <= 2 * tm_cap:
        tm_eff = _round_up(pl.cdiv(B, 2), 8)
    else:
        tm_eff = max(8, min(tm_cap, _round_up(B, 8)))
    grid = (pl.cdiv(B, tm_eff),)

    const = lambda shape: pl.BlockSpec(shape, lambda i: (0,) * len(shape))
    batched = lambda cols: pl.BlockSpec((tm_eff, cols), lambda i: (i, 0))

    out_padded = pl.pallas_call(
        _mlp_softmax_kernel,
        out_shape=jax.ShapeDtypeStruct((B, head_dim), jnp.float32),
        grid=grid,
        in_specs=[
            batched(nb_states), batched(nb_obs),
            const(w1.shape), const(b1.shape),
            const(w2.shape), const(b2.shape),
            const(w3.shape), const(b3.shape),
        ],
        out_specs=batched(head_dim),
        compiler_params=pltpu.CompilerParams(
            dimension_semantics=("parallel",)),
    )(xs, xo, w1, b1, w2, b2, w3, b3)

    if return_padded:
        return out_padded
    # Exact original-module contract: slice back to the true output width.
    return out_padded[:, :out_dim]


def init_params(key, nb_states, nb_obs, output, hidden1, hidden2, init_w=0.003):
    """Init mirroring the PyTorch module's init_weights().

    PyTorch weight shape is (out, in); fanin_init uses fanin = size[0] = out
    (the module's quirk is preserved). Biases keep nn.Linear's default
    U(-1/sqrt(in), 1/sqrt(in)).

    Kernel layout: weights transposed to (in, out) and stored bf16; biases f32
    of shape (1, out). Head weight/bias are padded to a multiple of 128 output
    columns (zero weight, -1e30 bias so exp() underflows to exactly 0).
    """
    in1 = nb_states + nb_obs
    head_dim = ((output + 127) // 128) * 128
    ks = jax.random.split(key, 6)

    def uniform(k, shape, bound):
        return jax.random.uniform(k, shape, jnp.float32, -bound, bound)

    # fc1: torch weight (hidden1, in1), fanin_init with fanin = hidden1.
    w1 = uniform(ks[0], (hidden1, in1), 1.0 / hidden1 ** 0.5).T.astype(jnp.bfloat16)
    b1 = uniform(ks[1], (1, hidden1), 1.0 / in1 ** 0.5)

    # fc2: torch weight (hidden2, hidden1), fanin_init with fanin = hidden2.
    w2 = uniform(ks[2], (hidden2, hidden1), 1.0 / hidden2 ** 0.5).T.astype(jnp.bfloat16)
    b2 = uniform(ks[3], (1, hidden2), 1.0 / hidden1 ** 0.5)

    # fc_head: torch weight (output, hidden2) ~ U(-init_w, init_w).
    w3 = uniform(ks[4], (output, hidden2), init_w).T                  # (hidden2, output)
    w3 = jnp.pad(w3, ((0, 0), (0, head_dim - output))).astype(jnp.bfloat16)
    b3 = uniform(ks[5], (1, output), 1.0 / hidden2 ** 0.5)
    b3 = jnp.pad(b3, ((0, 0), (0, head_dim - output)), constant_values=_NEG_BIG)

    return (w1, b1, w2, b2, w3, b3)


if __name__ == "__main__":
    # Small shapes consistent with the module's MLP; batch large enough to
    # exercise the tiled, pipelined 2-step grid (TM=256 at B=512).
    B, nb_states, nb_obs = 512, 16, 16
    hidden1, hidden2, output = 128, 128, 16

    key = jax.random.PRNGKey(0)
    k_xs, k_xo, k_p = jax.random.split(key, 3)
    xs = jax.random.normal(k_xs, (B, nb_states), jnp.float32)
    xo = jax.random.normal(k_xo, (B, nb_obs), jnp.float32)
    params = init_params(k_p, nb_states, nb_obs, output, hidden1, hidden2)

    out = agent_actor_binary_forward(xs, xo, params, out_dim=output)
    out = jax.block_until_ready(out)
    assert out.shape == (B, output)

    # Padded-slab fast path: padded columns are exactly 0, valid columns match.
    out_pad = agent_actor_binary_forward(xs, xo, params, out_dim=output,
                                         return_padded=True)
    out_pad = jax.block_until_ready(out_pad)
    assert out_pad.shape[1] % 128 == 0
    assert jnp.all(out_pad[:, output:] == 0.0)
    assert jnp.array_equal(out_pad[:, :output], out)

    # Pure-JAX reference using the same bf16 weights / f32 accumulation.
    w1, b1, w2, b2, w3, b3 = params
    x_cat = jnp.concatenate([xs, xo], axis=1).astype(jnp.bfloat16)
    h1 = jnp.maximum(
        jnp.dot(x_cat, w1, preferred_element_type=jnp.float32) + b1, 0.0)
    h2 = jnp.maximum(
        jnp.dot(h1.astype(jnp.bfloat16), w2, preferred_element_type=jnp.float32) + b2,
        0.0)
    logits = jnp.dot(h2.astype(jnp.bfloat16), w3,
                     preferred_element_type=jnp.float32) + b3
    ref = jax.nn.softmax(logits[:, :output], axis=-1)

    # Tolerance covers the approx (EUP) reciprocal in the softmax denominator.
    assert jnp.allclose(out, ref, atol=2e-3, rtol=2e-3), \
        float(jnp.max(jnp.abs(out - ref)))
    assert jnp.allclose(jnp.sum(out, axis=-1), 1.0, atol=2e-3)

    print("KERNEL_OK")
</pallas_src>

<mosaic_0001>
module attributes {stable_mosaic.version = 11 : i64} {
  func.func @_mlp_softmax_kernel(%arg0: i32, %arg1: memref<256x16xf32, #tpu.memory_space<vmem>>, %arg2: memref<256x16xf32, #tpu.memory_space<vmem>>, %arg3: memref<32x128xbf16, #tpu.memory_space<vmem>>, %arg4: memref<1x128xf32, #tpu.memory_space<vmem>>, %arg5: memref<128x128xbf16, #tpu.memory_space<vmem>>, %arg6: memref<1x128xf32, #tpu.memory_space<vmem>>, %arg7: memref<128x128xbf16, #tpu.memory_space<vmem>>, %arg8: memref<1x128xf32, #tpu.memory_space<vmem>>, %arg9: memref<256x128xf32, #tpu.memory_space<vmem>>) attributes {dimension_semantics = [#tpu.dimension_semantics<parallel>], iteration_bounds = array<i64: 2>, scalar_prefetch = 0 : i64, scratch_operands = 0 : i64, tpu.core_type = #tpu.core_type<tc>, window_params = [{transform_indices = @transform_0, window_bounds = array<i64: 256, 16>}, {transform_indices = @transform_1, window_bounds = array<i64: 256, 16>}, {pipeline_mode = #tpu.pipeline_mode<synchronous>, transform_indices = @transform_2, window_bounds = array<i64: 32, 128>}, {pipeline_mode = #tpu.pipeline_mode<synchronous>, transform_indices = @transform_3, window_bounds = array<i64: 1, 128>}, {pipeline_mode = #tpu.pipeline_mode<synchronous>, transform_indices = @transform_4, window_bounds = array<i64: 128, 128>}, {pipeline_mode = #tpu.pipeline_mode<synchronous>, transform_indices = @transform_5, window_bounds = array<i64: 1, 128>}, {pipeline_mode = #tpu.pipeline_mode<synchronous>, transform_indices = @transform_6, window_bounds = array<i64: 128, 128>}, {pipeline_mode = #tpu.pipeline_mode<synchronous>, transform_indices = @transform_7, window_bounds = array<i64: 1, 128>}, {transform_indices = @transform_8, window_bounds = array<i64: 256, 128>}]} {
    %c0 = arith.constant 0 : index
    %c0_0 = arith.constant 0 : index
    %0 = vector.load %arg1[%c0, %c0_0] : memref<256x16xf32, #tpu.memory_space<vmem>>, vector<256x16xf32>
    %c0_1 = arith.constant 0 : index
    %c0_2 = arith.constant 0 : index
    %1 = vector.load %arg2[%c0_1, %c0_2] : memref<256x16xf32, #tpu.memory_space<vmem>>, vector<256x16xf32>
    %2 = tpu.concatenate %0, %1 in 1 : vector<256x16xf32>, vector<256x16xf32> -> vector<256x32xf32>
    %3 = arith.truncf %2 : vector<256x32xf32> to vector<256x32xbf16>
    %c0_3 = arith.constant 0 : index
    %c0_4 = arith.constant 0 : index
    %4 = vector.load %arg3[%c0_3, %c0_4] : memref<32x128xbf16, #tpu.memory_space<vmem>>, vector<32x128xbf16>
    %cst = arith.constant dense<0.000000e+00> : vector<256x128xf32>
    %5 = tpu.matmul %3, %4, %cst {dimension_numbers = #tpu.dot_dimension_numbers<[1], [0], [0], [1], [0, 0, 1, 1], [], []>} : vector<256x32xbf16>, vector<32x128xbf16>, vector<256x128xf32> -> vector<256x128xf32>
    %c0_5 = arith.constant 0 : index
    %c0_6 = arith.constant 0 : index
    %6 = vector.load %arg4[%c0_5, %c0_6] : memref<1x128xf32, #tpu.memory_space<vmem>>, vector<1x128xf32>
    %7 = vector.broadcast %6 : vector<1x128xf32> to vector<256x128xf32>
    %8 = arith.addf %5, %7 : vector<256x128xf32>
    %cst_7 = arith.constant 0.000000e+00 : f32
    %9 = vector.broadcast %cst_7 : f32 to vector<256x128xf32>
    %10 = arith.maximumf %8, %9 : vector<256x128xf32>
    %11 = arith.truncf %10 : vector<256x128xf32> to vector<256x128xbf16>
    %c0_8 = arith.constant 0 : index
    %c0_9 = arith.constant 0 : index
    %12 = vector.load %arg5[%c0_8, %c0_9] : memref<128x128xbf16, #tpu.memory_space<vmem>>, vector<128x128xbf16>
    %cst_10 = arith.constant dense<0.000000e+00> : vector<256x128xf32>
    %13 = tpu.matmul %11, %12, %cst_10 {dimension_numbers = #tpu.dot_dimension_numbers<[1], [0], [0], [1], [0, 0, 1, 1], [], []>} : vector<256x128xbf16>, vector<128x128xbf16>, vector<256x128xf32> -> vector<256x128xf32>
    %c0_11 = arith.constant 0 : index
    %c0_12 = arith.constant 0 : index
    %14 = vector.load %arg6[%c0_11, %c0_12] : memref<1x128xf32, #tpu.memory_space<vmem>>, vector<1x128xf32>
    %15 = vector.broadcast %14 : vector<1x128xf32> to vector<256x128xf32>
    %16 = arith.addf %13, %15 : vector<256x128xf32>
    %cst_13 = arith.constant 0.000000e+00 : f32
    %17 = vector.broadcast %cst_13 : f32 to vector<256x128xf32>
    %18 = arith.maximumf %16, %17 : vector<256x128xf32>
    %19 = arith.truncf %18 : vector<256x128xf32> to vector<256x128xbf16>
    %c0_14 = arith.constant 0 : index
    %c0_15 = arith.constant 0 : index
    %20 = vector.load %arg7[%c0_14, %c0_15] : memref<128x128xbf16, #tpu.memory_space<vmem>>, vector<128x128xbf16>
    %cst_16 = arith.constant dense<0.000000e+00> : vector<256x128xf32>
    %21 = tpu.matmul %19, %20, %cst_16 {dimension_numbers = #tpu.dot_dimension_numbers<[1], [0], [0], [1], [0, 0, 1, 1], [], []>} : vector<256x128xbf16>, vector<128x128xbf16>, vector<256x128xf32> -> vector<256x128xf32>
    %c0_17 = arith.constant 0 : index
    %c0_18 = arith.constant 0 : index
    %22 = vector.load %arg8[%c0_17, %c0_18] : memref<1x128xf32, #tpu.memory_space<vmem>>, vector<1x128xf32>
    %23 = vector.broadcast %22 : vector<1x128xf32> to vector<256x128xf32>
    %24 = arith.addf %21, %23 : vector<256x128xf32>
    %cst_19 = arith.constant dense<0xFF800000> : vector<256xf32>
    %25 = vector.multi_reduction <maximumf>, %24, %cst_19 [1] : vector<256x128xf32> to vector<256xf32>
    %26 = vector.shape_cast %25 : vector<256xf32> to vector<256x1xf32>
    %27 = vector.broadcast %26 : vector<256x1xf32> to vector<256x128xf32>
    %28 = arith.subf %24, %27 : vector<256x128xf32>
    %29 = math.exp %28 : vector<256x128xf32>
    %cst_20 = arith.constant dense<0.000000e+00> : vector<256xf32>
    %30 = vector.multi_reduction <add>, %29, %cst_20 [1] : vector<256x128xf32> to vector<256xf32>
    %31 = vector.shape_cast %30 : vector<256xf32> to vector<256x1xf32>
    %32 = tpu.reciprocal %31 {approx = true} : vector<256x1xf32> -> vector<256x1xf32>
    %33 = vector.broadcast %32 : vector<256x1xf32> to vector<256x128xf32>
    %34 = arith.mulf %29, %33 : vector<256x128xf32>
    %c0_21 = arith.constant 0 : index
    %c0_22 = arith.constant 0 : index
    %35 = vector.load %arg9[%c0_21, %c0_22] : memref<256x128xf32, #tpu.memory_space<vmem>>, vector<256x128xf32>
    tpu.vector_store %arg9[%c0_21, %c0_22], %34 {strides = array<i32>} : memref<256x128xf32, #tpu.memory_space<vmem>>, vector<256x128xf32>,
    return
  }
  func.func @transform_0(%arg0: i32) -> (i32, i32) {
    %c0_i32 = arith.constant 0 : i32
    %c0_i32_0 = arith.constant 0 : i32
    return %arg0, %c0_i32 : i32, i32
  }
  func.func @transform_1(%arg0: i32) -> (i32, i32) {
    %c0_i32 = arith.constant 0 : i32
    %c0_i32_0 = arith.constant 0 : i32
    return %arg0, %c0_i32 : i32, i32
  }
  func.func @transform_2(%arg0: i32) -> (i32, i32) {
    %c0_i32 = arith.constant 0 : i32
    %c0_i32_0 = arith.constant 0 : i32
    %c0_i32_1 = arith.constant 0 : i32
    return %c0_i32, %c0_i32_0 : i32, i32
  }
  func.func @transform_3(%arg0: i32) -> (i32, i32) {
    %c0_i32 = arith.constant 0 : i32
    %c0_i32_0 = arith.constant 0 : i32
    %c0_i32_1 = arith.constant 0 : i32
    return %c0_i32, %c0_i32_0 : i32, i32
  }
  func.func @transform_4(%arg0: i32) -> (i32, i32) {
    %c0_i32 = arith.constant 0 : i32
    %c0_i32_0 = arith.constant 0 : i32
    %c0_i32_1 = arith.constant 0 : i32
    return %c0_i32, %c0_i32_0 : i32, i32
  }
  func.func @transform_5(%arg0: i32) -> (i32, i32) {
    %c0_i32 = arith.constant 0 : i32
    %c0_i32_0 = arith.constant 0 : i32
    %c0_i32_1 = arith.constant 0 : i32
    return %c0_i32, %c0_i32_0 : i32, i32
  }
  func.func @transform_6(%arg0: i32) -> (i32, i32) {
    %c0_i32 = arith.constant 0 : i32
    %c0_i32_0 = arith.constant 0 : i32
    %c0_i32_1 = arith.constant 0 : i32
    return %c0_i32, %c0_i32_0 : i32, i32
  }
  func.func @transform_7(%arg0: i32) -> (i32, i32) {
    %c0_i32 = arith.constant 0 : i32
    %c0_i32_0 = arith.constant 0 : i32
    %c0_i32_1 = arith.constant 0 : i32
    return %c0_i32, %c0_i32_0 : i32, i32
  }
  func.func @transform_8(%arg0: i32) -> (i32, i32) {
    %c0_i32 = arith.constant 0 : i32
    %c0_i32_0 = arith.constant 0 : i32
    return %arg0, %c0_i32 : i32, i32
  }
}

</mosaic_0001>

<bundles_post_ra>
// kernel: agent_actor_binary_forward.1
= control target key start
LH: loop header
LB: loop body
LE: loop exit
PB: predicated region body
PF: predicated region fallthrough
CT: control target
= control target key end

     0   :  { %s2295_s27 = smov 0   ;;  %s2918_s0 = inlined_call_operand.vmem [shape: f32[512,16], index: 0, kind: input, shape index: {}]   ;;  %s2919_s1 = inlined_call_operand.vmem [shape: f32[512,16], index: 1, kind: input, shape index: {}]   ;;  %s2920_s2 = inlined_call_operand.vmem [shape: bf16[32,128], index: 2, kind: input, shape index: {}]   ;;  %s2921_s3 = inlined_call_operand.vmem [shape: f32[1,128], index: 3, kind: input, shape index: {}]   ;;  %s2922_s4 = inlined_call_operand.vmem [shape: bf16[128,128], index: 4, kind: input, shape index: {}]   ;;  %s2923_s5 = inlined_call_operand.vmem [shape: f32[1,128], index: 5, kind: input, shape index: {}]   ;;  %s2924_s6 = inlined_call_operand.vmem [shape: bf16[128,128], index: 6, kind: input, shape index: {}]   ;;  %s2925_s7 = inlined_call_operand.vmem [shape: f32[1,128], index: 7, kind: input, shape index: {}]   ;;  %s2926_s8 = inlined_call_operand.vmem [shape: f32[512,128], index: 8, kind: output, shape index: {}]  }
   0x1 LB: > { %s1754_s28 = sadd.s32 4294967295, %s2247_s27   ;;  %p1758_p0 = scmp.ge.s32.totalorder %s2247_s27, 1  ;;  %s2247_s27 = sphi %s2295_s27, %s18_s27  }
   0x2   : > { %p274_p1 = scmp.lt.s32.totalorder %s2247_s27, 3 }
   0x4   : > { %p275_p2 = pnand %p1758_p0, %p274_p1 }
   0x5   : > { %s1759_s29 = sshll.u32 (!%p275_p2), %s1754_s28, 5  ;;  %v2095_v0 = vld [vmem:[%s2920_s2] sm:$0xff] (!%p275_p2)   ;;  %v2096_v1 = vld [vmem:[%s2920_s2 + $0x8] sm:$0xff] (!%p275_p2)   ;;  %s2249_s16 = smov (!%p275_p2), 16   ;;  %vm524_vm0 = vcmask (!%p275_p2), 130048   ;;  %vm596_vm1 = vcmask (!%p275_p2), 261120  }
   0x6   : > { %278 = sbr.rel (%p275_p2) target bundleno = 1183 (0x49f), region = 52  ;;  %p314_p3 = scmp.lt.s32.totalorder (!%p275_p2), %s1759_s29, 63  ;;  %1870 = vmatprep.subr.bf16.mxu0 (!%p275_p2), %v2095_v0  ;;  %2002 = vmatprep.subr.bf16.mxu1 (!%p275_p2), %v2095_v0  ;;  %v2368_v50 = vld [vmem:[%s2922_s4] sm:$0xff] (!%p275_p2)  }
   0x7   : > { %1871 = vmatpush3.bf16.msra.mxu0 (!%p275_p2), %v2095_v0  ;;  %2004 = vmatpush3.bf16.msra.mxu1 (!%p275_p2), %v2095_v0 }
   0x8   : > { %1872 = vmatprep.subr.bf16.mxu0 (!%p275_p2), %v2096_v1  ;;  %2003 = vmatprep.subr.bf16.mxu1 (!%p275_p2), %v2096_v1 }
   0xb   : > { %1873 = vmatpush3.bf16.msra.mxu0 (!%p275_p2), %v2096_v1  ;;  %2005 = vmatpush3.bf16.msra.mxu1 (!%p275_p2), %v2096_v1 }
   0xc   : > { %1906 = vmatprep.subr.bf16.mxu1 (!%p275_p2), %v2368_v50 }
   0xd   : > { %s2928_s29 = smov (!%p314_p3, %s1759_s29), 63 }
   0xe   : > { %s2309_s12 = sshll.u32 %s2928_s29, 3 }
   0xf   : > { %s2315_s15 = scalar_lea.vmem %s2919_s1, %s2309_s12  ;;  %s2375_s21 = scalar_lea.vmem %s2918_s0, %s2309_s12 }
  0x10   : > { %v364_v2 = vld [vmem:[%s2315_s15] sm:$0xff]  ;;  %v365_v3 = vld [vmem:[%s2315_s15 + $0x8] sm:$0xff]  ;;  %v366_v4 = vld [vmem:[%s2315_s15 + $0x10] sm:$0xff]  ;;  %s2849_s20 = scalar_lea.vmem %s2926_s8, %s2309_s12 }
  0x11   : > { %v2015_v5 = vpack.i.bf16 %v365_v3, %v364_v2  ;;  %v367_v6 = vld [vmem:[%s2315_s15 + $0x18] sm:$0xff]  ;;  %v368_v7 = vld [vmem:[%s2315_s15 + $0x20] sm:$0xff]  ;;  %v369_v8 = vld [vmem:[%s2315_s15 + $0x28] sm:$0xff] }
  0x12   : > { %v2025_v9 = vpack.i.bf16 %v369_v8, %v368_v7  ;;  %v370_v10 = vld [vmem:[%s2315_s15 + $0x30] sm:$0xff]  ;;  %v371_v11 = vld [vmem:[%s2315_s15 + $0x38] sm:$0xff]  ;;  %v2020_v12 = vpack.i.bf16 %v367_v6, %v366_v4  ;;  %v372_v14 = vld [vmem:[%s2315_s15 + $0x40] sm:$0xff] }
  0x13   : > { %2016 = vrot.lane.b32.xlu0 %v2015_v5, %s2249_s16  ;;  %v2030_v13 = vpack.i.bf16 %v371_v11, %v370_v10  ;;  %v373_v15 = vld [vmem:[%s2315_s15 + $0x48] sm:$0xff]  ;;  %v374_v16 = vld [vmem:[%s2315_s15 + $0x50] sm:$0xff]  ;;  %v375_v17 = vld [vmem:[%s2315_s15 + $0x58] sm:$0xff] }
  0x14   : > { %2026 = vrot.lane.b32.xlu1 %v2025_v9, %s2249_s16  ;;  %v2035_v18 = vpack.i.bf16 %v373_v15, %v372_v14  ;;  %v2040_v19 = vpack.i.bf16 %v375_v17, %v374_v16  ;;  %v376_v20 = vld [vmem:[%s2315_s15 + $0x60] sm:$0xff]  ;;  %v377_v21 = vld [vmem:[%s2315_s15 + $0x68] sm:$0xff]  ;;  %v378_v22 = vld [vmem:[%s2315_s15 + $0x70] sm:$0xff] }
  0x15   : > { %v379_v23 = vld [vmem:[%s2315_s15 + $0x78] sm:$0xff]  ;;  %v2045_v24 = vpack.i.bf16 %v377_v21, %v376_v20  ;;  %v380_v26 = vld [vmem:[%s2315_s15 + $0x80] sm:$0xff]  ;;  %v381_v27 = vld [vmem:[%s2315_s15 + $0x88] sm:$0xff] }
  0x16   : > { %v2050_v25 = vpack.i.bf16 %v379_v23, %v378_v22  ;;  %v382_v28 = vld [vmem:[%s2315_s15 + $0x90] sm:$0xff]  ;;  %v383_v29 = vld [vmem:[%s2315_s15 + $0x98] sm:$0xff]  ;;  %v2055_v30 = vpack.i.bf16 %v381_v27, %v380_v26  ;;  %v384_v31 = vld [vmem:[%s2315_s15 + $0xa0] sm:$0xff] }
  0x17   : > { %2021 = vrot.lane.b32.xlu0 %v2020_v12, %s2249_s16  ;;  %v385_v32 = vld [vmem:[%s2315_s15 + $0xa8] sm:$0xff]  ;;  %v386_v33 = vld [vmem:[%s2315_s15 + $0xb0] sm:$0xff]  ;;  %v2060_v34 = vpack.i.bf16 %v383_v29, %v382_v28  ;;  %v387_v35 = vld [vmem:[%s2315_s15 + $0xb8] sm:$0xff] }
  0x18   : > { %2031 = vrot.lane.b32.xlu1 %v2030_v13, %s2249_s16  ;;  %v388_v36 = vld [vmem:[%s2315_s15 + $0xc0] sm:$0xff]  ;;  %v389_v37 = vld [vmem:[%s2315_s15 + $0xc8] sm:$0xff]  ;;  %v2065_v38 = vpack.i.bf16 %v385_v32, %v384_v31  ;;  %v390_v39 = vld [vmem:[%s2315_s15 + $0xd0] sm:$0xff]  ;;  %v2070_v41 = vpack.i.bf16 %v387_v35, %v386_v33 }
  0x19   : > { %v391_v40 = vld [vmem:[%s2315_s15 + $0xd8] sm:$0xff]  ;;  %v2075_v42 = vpack.i.bf16 %v389_v37, %v388_v36  ;;  %v392_v44 = vld [vmem:[%s2315_s15 + $0xe0] sm:$0xff]  ;;  %v393_v45 = vld [vmem:[%s2315_s15 + $0xe8] sm:$0xff] }
  0x1a   : > { %v2080_v43 = vpack.i.bf16 %v391_v40, %v390_v39  ;;  %v394_v46 = vld [vmem:[%s2315_s15 + $0xf0] sm:$0xff]  ;;  %v395_v47 = vld [vmem:[%s2315_s15 + $0xf8] sm:$0xff]  ;;  %v2085_v48 = vpack.i.bf16 %v393_v45, %v392_v44  ;;  %v332_v52 = vld [vmem:[%s2375_s21] sm:$0xff] }
  0x1b   : > { %2036 = vrot.lane.b32.xlu0 %v2035_v18, %s2249_s16  ;;  %v2090_v49 = vpack.i.bf16 %v395_v47, %v394_v46  ;;  %v333_v53 = vld [vmem:[%s2375_s21 + $0x8] sm:$0xff]  ;;  %v336_v57 = vld [vmem:[%s2375_s21 + $0x20] sm:$0xff]  ;;  %v334_v0 = vld [vmem:[%s2375_s21 + $0x10] sm:$0xff] }
  0x1c   : > { %2041 = vrot.lane.b32.xlu1 %v2040_v19, %s2249_s16  ;;  %v337_v58 = vld [vmem:[%s2375_s21 + $0x28] sm:$0xff]  ;;  %v335_v1 = vld [vmem:[%s2375_s21 + $0x18] sm:$0xff]  ;;  %v338_v14 = vld [vmem:[%s2375_s21 + $0x30] sm:$0xff] }
  0x1d   : > { %v339_v15 = vld [vmem:[%s2375_s21 + $0x38] sm:$0xff]  ;;  %v340_v19 = vld [vmem:[%s2375_s21 + $0x40] sm:$0xff]  ;;  %v341_v20 = vld [vmem:[%s2375_s21 + $0x48] sm:$0xff] }
  0x1e   : > { %v342_v32 = vld [vmem:[%s2375_s21 + $0x50] sm:$0xff]  ;;  %v343_v33 = vld [vmem:[%s2375_s21 + $0x58] sm:$0xff]  ;;  %v344_v36 = vld [vmem:[%s2375_s21 + $0x60] sm:$0xff] }
  0x1f   : > { %2046 = vrot.lane.b32.xlu0 %v2045_v24, %s2249_s16  ;;  %v349_v39 = vld [vmem:[%s2375_s21 + $0x88] sm:$0xff]  ;;  %v350_v44 = vld [vmem:[%s2375_s21 + $0x90] sm:$0xff]  ;;  %v351_v45 = vld [vmem:[%s2375_s21 + $0x98] sm:$0xff] }
  0x20   : > { %2051 = vrot.lane.b32.xlu1 %v2050_v25, %s2249_s16  ;;  %v345_v40 = vld [vmem:[%s2375_s21 + $0x68] sm:$0xff] }
  0x23   : > { %2056 = vrot.lane.b32.xlu0 %v2055_v30, %s2249_s16 }
  0x24   : > { %2061 = vrot.lane.b32.xlu1 %v2060_v34, %s2249_s16 }
  0x27   : > { %2066 = vrot.lane.b32.xlu0 %v2065_v38, %s2249_s16  ;;  %v348_v38 = vld [vmem:[%s2375_s21 + $0x80] sm:$0xff] }
  0x28   : > { %2071 = vrot.lane.b32.xlu1 %v2070_v41, %s2249_s16 }
  0x2b   : > { %2076 = vrot.lane.b32.xlu0 %v2075_v42, %s2249_s16 }
  0x2c   : > { %2081 = vrot.lane.b32.xlu1 %v2080_v43, %s2249_s16 }
  0x2f   : > { %2086 = vrot.lane.b32.xlu0 %v2085_v48, %s2249_s16 }
  0x30   : > { %2091 = vrot.lane.b32.xlu1 %v2090_v49, %s2249_s16 }
  0x85   : > { %v2017_v51 = vpop.permute.xlu0 %2016 }
  0x86   : > { %v2019_v54 = vunpack.i.h.bf16 %v2017_v51  ;;  %v2018_v55 = vunpack.i.l.bf16 %v2017_v51  ;;  %v2027_v56 = vpop.permute.xlu1 %2026 }
  0x87   : > { %v2029_v59 = vunpack.i.h.bf16 %v2027_v56  ;;  %v2028_v60 = vunpack.i.l.bf16 %v2027_v56 }
  0x88   : > { %v525_v61 = vsel %vm524_vm0, %v332_v52, %v2018_v55  ;;  %v526_v62 = vsel %vm524_vm0, %v333_v53, %v2019_v54 }
  0x89   : > { %v2022_v63 = vpop.permute.xlu0 %2021  ;;  %v557_v2 = vpack.c.bf16 %v526_v62, %v525_v61  ;;  %v529_v3 = vsel %vm524_vm0, %v336_v57, %v2028_v60  ;;  %v530_v4 = vsel %vm524_vm0, %v337_v58, %v2029_v59  ;;  %v352_v59 = vld [vmem:[%s2375_s21 + $0xa0] sm:$0xff]  ;;  %v353_v60 = vld [vmem:[%s2375_s21 + $0xa8] sm:$0xff] }
  0x8a   : > { %v2024_v5 = vunpack.i.h.bf16 %v2022_v63  ;;  %v2023_v6 = vunpack.i.l.bf16 %v2022_v63  ;;  %v2032_v7 = vpop.permute.xlu1 %2031  ;;  %v559_v8 = vpack.c.bf16 %v530_v4, %v529_v3  ;;  %v2098_v3 = vld [vmem:[%s2922_s4 + $0x8] sm:$0xff]  }
  0x8b   : > { %1874 = vmatprep.mubr.msk.bf16.mxu0 %vm596_vm1, %v557_v2  ;;  %v2034_v11 = vunpack.i.h.bf16 %v2032_v7  ;;  %v2033_v12 = vunpack.i.l.bf16 %v2032_v7  ;;  %v355_v2 = vld [vmem:[%s2375_s21 + $0xb8] sm:$0xff] }
  0x8c   : > { %v527_v9 = vsel %vm524_vm0, %v334_v0, %v2023_v6  ;;  %v528_v10 = vsel %vm524_vm0, %v335_v1, %v2024_v5  ;;  %v354_v1 = vld [vmem:[%s2375_s21 + $0xb0] sm:$0xff] }
  0x8d   : > { %v558_v13 = vpack.c.bf16 %v528_v10, %v527_v9  ;;  %v2037_v16 = vpop.permute.xlu0 %2036  ;;  %v531_v22 = vsel %vm524_vm0, %v338_v14, %v2033_v12  ;;  %v532_v23 = vsel %vm524_vm0, %v339_v15, %v2034_v11  ;;  %v346_v10 = vld [vmem:[%s2375_s21 + $0x70] sm:$0xff] }
  0x8e   : > { %v2039_v17 = vunpack.i.h.bf16 %v2037_v16  ;;  %v2038_v18 = vunpack.i.l.bf16 %v2037_v16  ;;  %v2042_v21 = vpop.permute.xlu1 %2041  ;;  %v560_v28 = vpack.c.bf16 %v532_v23, %v531_v22  ;;  %v2099_v23 = vld [vmem:[%s2922_s4 + $0x10] sm:$0xff]  }
  0x8f   : > { %1875 = vmatmul.mubr.msk.bf16.vlgmr.msra.gmra.mrb[0].mxu0 %vm596_vm1, %v558_v13  ;;  %v2043_v29 = vunpack.i.l.bf16 %v2042_v21  ;;  %v2044_v31 = vunpack.i.h.bf16 %v2042_v21  ;;  %v347_v13 = vld [vmem:[%s2375_s21 + $0x78] sm:$0xff] }
  0x90   : > { %1878 = vmatprep.mubr.msk.bf16.mxu0 %vm596_vm1, %v559_v8  ;;  %v533_v24 = vsel %vm524_vm0, %v340_v19, %v2038_v18  ;;  %v534_v25 = vsel %vm524_vm0, %v341_v20, %v2039_v17  ;;  %v356_v18 = vld [vmem:[%s2375_s21 + $0xc0] sm:$0xff]  ;;  %v357_v19 = vld [vmem:[%s2375_s21 + $0xc8] sm:$0xff] }
  0x91   : > { %v2047_v26 = vpop.permute.xlu0 %2046  ;;  %v561_v30 = vpack.c.bf16 %v534_v25, %v533_v24  ;;  %v535_v46 = vsel %vm524_vm0, %v342_v32, %v2043_v29  ;;  %v536_v49 = vsel %vm524_vm0, %v343_v33, %v2044_v31  ;;  %v358_v32 = vld [vmem:[%s2375_s21 + $0xd0] sm:$0xff]  ;;  %v359_v33 = vld [vmem:[%s2375_s21 + $0xd8] sm:$0xff] }
  0x92   : > { %v2400_v27 = vpop.permute.xlu1 %2051  ;;  %v2048_v34 = vunpack.i.l.bf16 %v2047_v26  ;;  %v2049_v35 = vunpack.i.h.bf16 %v2047_v26  ;;  %v562_v4 = vpack.c.bf16 %v536_v49, %v535_v46 }
  0x93   : > { %v2053_v5 = vunpack.i.l.bf16 %v2400_v27  ;;  %v2054_v9 = vunpack.i.h.bf16 %v2400_v27 }
  0x94   : > { %v537_v51 = vsel %vm524_vm0, %v344_v36, %v2048_v34  ;;  %v538_v54 = vsel %vm524_vm0, %v345_v40, %v2049_v35  ;;  %v2100_v36 = vld [vmem:[%s2922_s4 + $0x18] sm:$0xff]  }
  0x95   : > { %v2057_v37 = vpop.permute.xlu0 %2056  ;;  %v563_v8 = vpack.c.bf16 %v538_v54, %v537_v51  ;;  %v539_v24 = vsel %vm524_vm0, %v346_v10, %v2053_v5  ;;  %v540_v25 = vsel %vm524_vm0, %v347_v13, %v2054_v9  ;;  %v362_v51 = vld [vmem:[%s2375_s21 + $0xf0] sm:$0xff] }
  0x96   : > { %v2059_v41 = vunpack.i.h.bf16 %v2057_v37  ;;  %v2058_v42 = vunpack.i.l.bf16 %v2057_v37  ;;  %v2062_v43 = vpop.permute.xlu1 %2061  ;;  %v564_v37 = vpack.c.bf16 %v540_v25, %v539_v24 }
  0x97   : > { %1879 = vmatmul.mubr.msk.bf16.gmra.mrb[4].mxu0 %vm596_vm1, %v560_v28  ;;  %v2064_v47 = vunpack.i.h.bf16 %v2062_v43  ;;  %v2063_v48 = vunpack.i.l.bf16 %v2062_v43 }
  0x98   : > { %1882 = vmatprep.mubr.msk.bf16.mxu0 %vm596_vm1, %v561_v30  ;;  %v541_v52 = vsel %vm524_vm0, %v348_v38, %v2058_v42  ;;  %v542_v53 = vsel %vm524_vm0, %v349_v39, %v2059_v41  ;;  %v360_v38 = vld [vmem:[%s2375_s21 + $0xe0] sm:$0xff]  ;;  %v361_v39 = vld [vmem:[%s2375_s21 + $0xe8] sm:$0xff] }
  0x99   : > { %v543_v55 = vsel %vm524_vm0, %v350_v44, %v2063_v48  ;;  %v544_v56 = vsel %vm524_vm0, %v351_v45, %v2064_v47  ;;  %v565_v57 = vpack.c.bf16 %v542_v53, %v541_v52  ;;  %v2067_v58 = vpop.permute.xlu0 %2066  ;;  %v2101_v45 = vld [vmem:[%s2922_s4 + $0x20] sm:$0xff]   ;;  %v363_v52 = vld [vmem:[%s2375_s21 + $0xf8] sm:$0xff]  ;;  %v2102_v53 = vld [vmem:[%s2922_s4 + $0x28] sm:$0xff]  }
  0x9a   : > { %v566_v61 = vpack.c.bf16 %v544_v56, %v543_v55  ;;  %v2069_v62 = vunpack.i.h.bf16 %v2067_v58  ;;  %v2068_v63 = vunpack.i.l.bf16 %v2067_v58  ;;  %v2072_v0 = vpop.permute.xlu1 %2071  ;;  %v2104_v58 = vld [vmem:[%s2922_s4 + $0x38] sm:$0xff]  }
  0x9b   : > { %1890 = vmatprep.mubr.msk.bf16.mxu1 %vm596_vm1, %v565_v57  ;;  %v2074_v6 = vunpack.i.h.bf16 %v2072_v0  ;;  %v2073_v7 = vunpack.i.l.bf16 %v2072_v0  ;;  %v2103_v57 = vld [vmem:[%s2922_s4 + $0x30] sm:$0xff]   ;;  %v2110_v0 = vld [vmem:[%s2924_s6 + $0x28] sm:$0xff]  }
  0x9c   : > { %1891 = vmatmul.mubr.msk.bf16.vlgmr.msra.gmra.mrb[0].mxu1 %vm596_vm1, %v566_v61  ;;  %v545_v11 = vsel %vm524_vm0, %v352_v59, %v2068_v63  ;;  %v546_v12 = vsel %vm524_vm0, %v353_v60, %v2069_v62  ;;  %v2105_v59 = vld [vmem:[%s2924_s6] sm:$0xff]   ;;  %v2106_v60 = vld [vmem:[%s2924_s6 + $0x8] sm:$0xff]   ;;  %v2107_v61 = vld [vmem:[%s2924_s6 + $0x10] sm:$0xff]  }
  0x9d   : > { %v567_v14 = vpack.c.bf16 %v546_v12, %v545_v11  ;;  %v547_v15 = vsel %vm524_vm0, %v354_v1, %v2073_v7  ;;  %v548_v16 = vsel %vm524_vm0, %v355_v2, %v2074_v6  ;;  %v2077_v17 = vpop.permute.xlu0 %2076  ;;  %1907 = vmatpush3.bf16.msra.mxu1 %v2368_v50  ;;  %1954 = vmatprep.subr.bf16.mxu0 %v2105_v59  ;;  %v2108_v62 = vld [vmem:[%s2924_s6 + $0x18] sm:$0xff]   ;;  %v2109_v63 = vld [vmem:[%s2924_s6 + $0x20] sm:$0xff]  }
  0x9e   : > { %v2079_v20 = vunpack.i.h.bf16 %v2077_v17  ;;  %v2078_v21 = vunpack.i.l.bf16 %v2077_v17  ;;  %v2082_v22 = vpop.permute.xlu1 %2081  ;;  %1908 = vmatprep.subr.bf16.mxu1 %v2098_v3  ;;  %v568_v50 = vpack.c.bf16 %v548_v16, %v547_v15  ;;  %1955 = vmatpush3.bf16.msra.mxu0 %v2105_v59  ;;  %v2504_v1 = vld [vmem:[%s2921_s3] ss:$0 sm:$0xff] }
  0x9f   : > { %1883 = vmatmul.mubr.msk.bf16.gmra.mrb[8].mxu0 %vm596_vm1, %v562_v4  ;;  %1894 = vmatprep.mubr.msk.bf16.mxu1 %vm596_vm1, %v567_v14  ;;  %v2084_v29 = vunpack.i.h.bf16 %v2082_v22  ;;  %v2083_v30 = vunpack.i.l.bf16 %v2082_v22 }
  0xa0   : > { %1886 = vmatprep.mubr.msk.bf16.mxu0 %vm596_vm1, %v563_v8  ;;  %v549_v26 = vsel %vm524_vm0, %v356_v18, %v2078_v21  ;;  %v550_v27 = vsel %vm524_vm0, %v357_v19, %v2079_v20  ;;  %1956 = vmatprep.subr.bf16.mxu0 %v2106_v60 }
  0xa1   : > { %v569_v28 = vpack.c.bf16 %v550_v27, %v549_v26  ;;  %v2087_v31 = vpop.permute.xlu0 %2086  ;;  %1909 = vmatpush3.bf16.msra.mxu1 %v2098_v3  ;;  %v551_v40 = vsel %vm524_vm0, %v358_v32, %v2083_v30  ;;  %v552_v41 = vsel %vm524_vm0, %v359_v33, %v2084_v29 }
  0xa2   : > { %v2089_v34 = vunpack.i.h.bf16 %v2087_v31  ;;  %v2088_v35 = vunpack.i.l.bf16 %v2087_v31  ;;  %1910 = vmatprep.subr.bf16.mxu1 %v2099_v23  ;;  %v2092_v44 = vpop.permute.xlu1 %2091  ;;  %v570_v46 = vpack.c.bf16 %v552_v41, %v551_v40  ;;  %1957 = vmatpush3.bf16.msra.mxu0 %v2106_v60 }
  0xa3   : > { %v2094_v48 = vunpack.i.h.bf16 %v2092_v44  ;;  %v2093_v49 = vunpack.i.l.bf16 %v2092_v44  ;;  %1958 = vmatprep.subr.bf16.mxu0 %v2107_v61 }
  0xa4   : > { %1895 = vmatmul.mubr.msk.bf16.gmra.mrb[4].mxu1 %vm596_vm1, %v568_v50  ;;  %v553_v42 = vsel %vm524_vm0, %v360_v38, %v2088_v35  ;;  %v554_v43 = vsel %vm524_vm0, %v361_v39, %v2089_v34 }
  0xa5   : > { %1898 = vmatprep.mubr.msk.bf16.mxu1 %vm596_vm1, %v569_v28  ;;  %1911 = vmatpush3.bf16.msra.mxu1 %v2099_v23  ;;  %v571_v47 = vpack.c.bf16 %v554_v43, %v553_v42  ;;  %v555_v54 = vsel %vm524_vm0, %v362_v51, %v2093_v49  ;;  %v556_v55 = vsel %vm524_vm0, %v363_v52, %v2094_v48 }
  0xa6   : > { %1912 = vmatprep.subr.bf16.mxu1 %v2100_v36  ;;  %v572_v56 = vpack.c.bf16 %v556_v55, %v555_v54  ;;  %1959 = vmatpush3.bf16.msra.mxu0 %v2107_v61 }
  0xa7   : > { %1887 = vmatmul.mubr.msk.bf16.gmra.mrb[12].mxu0 %vm596_vm1, %v564_v37  ;;  %1960 = vmatprep.subr.bf16.mxu0 %v2108_v62 }
  0xa9   : > { %1913 = vmatpush3.bf16.msra.mxu1 %v2100_v36 }
  0xaa   : > { %1914 = vmatprep.subr.bf16.mxu1 %v2101_v45  ;;  %1961 = vmatpush3.bf16.msra.mxu0 %v2108_v62 }
  0xab   : > { %1962 = vmatprep.subr.bf16.mxu0 %v2109_v63 }
  0xac   : > { %1899 = vmatmul.mubr.msk.bf16.gmra.mrb[8].mxu1 %vm596_vm1, %v570_v46 }
  0xad   : > { %1902 = vmatprep.mubr.msk.bf16.mxu1 %vm596_vm1, %v571_v47  ;;  %1915 = vmatpush3.bf16.msra.mxu1 %v2101_v45 }
  0xae   : > { %1916 = vmatprep.subr.bf16.mxu1 %v2102_v53  ;;  %1963 = vmatpush3.bf16.msra.mxu0 %v2109_v63 }
  0xaf   : > { %1964 = vmatprep.subr.bf16.mxu0 %v2110_v0 }
  0xb1   : > { %1917 = vmatpush3.bf16.msra.mxu1 %v2102_v53 }
  0xb2   : > { %1918 = vmatprep.subr.bf16.mxu1 %v2103_v57  ;;  %1965 = vmatpush3.bf16.msra.mxu0 %v2110_v0 }
  0xb4   : > { %1903 = vmatmul.mubr.msk.bf16.gmra.mrb[12].mxu1 %vm596_vm1, %v572_v56 }
  0xb5   : > { %1919 = vmatpush3.bf16.msra.mxu1 %v2103_v57 }
  0xb6   : > { %1920 = vmatprep.subr.bf16.mxu1 %v2104_v58 }
  0xb9   : > { %1921 = vmatpush3.bf16.msra.mxu1 %v2104_v58 }
 0x162   : > { %v1876_v2 = vpop.f32.mrb[0].mxu0 }
 0x163   : > { %v688_v3 = vadd.f32 %v1876_v2, %v2504_v1  ;;  %v679_v4 = vpop.f32.mrb[1].mxu0 }
 0x164   : > { %v680_v5 = vadd.f32 %v2504_v1, %v679_v4  ;;  %v1877_v6 = vpop.f32.mrb[2].mxu0 }
 0x165   : > { %v691_v7 = vadd.f32 %v1877_v6, %v2504_v1  ;;  %v682_v8 = vpop.f32.mrb[3].mxu0  ;;  %v808_v10 = vmax.f32 %v688_v3, 0.0 }
 0x166   : > { %v683_v9 = vadd.f32 %v2504_v1, %v682_v8  ;;  %v806_v12 = vmax.f32 %v680_v5, 0.0 }
 0x167   : > { %v809_v11 = vmax.f32 %v691_v7, 0.0 }
 0x168   : > { %v807_v13 = vmax.f32 %v683_v9, 0.0 }
 0x169   : > { %v839_v14 = vpack.c.bf16 %v809_v11, %v808_v10 }
 0x16a   : > { %v838_v15 = vpack.c.bf16 %v807_v13, %v806_v12  ;;  %v1880_v16 = vpop.f32.mrb[4].mxu0 }
 0x16b   : > { %v704_v17 = vadd.f32 %v1880_v16, %v2504_v1  ;;  %v695_v18 = vpop.f32.mrb[5].mxu0 }
 0x16c   : > { %v696_v19 = vadd.f32 %v2504_v1, %v695_v18  ;;  %v1881_v20 = vpop.f32.mrb[6].mxu0  ;;  %1922 = vmatprep.mubr.bf16.mxu1 %v838_v15 }
 0x16d   : > { %v812_v21 = vmax.f32 %v704_v17, 0.0  ;;  %v707_v22 = vadd.f32 %v1881_v20, %v2504_v1  ;;  %v698_v23 = vpop.f32.mrb[7].mxu0  ;;  %1923 = vmatmul.mubr.bf16.vlgmr.msra.gmra.mrb[16].mxu1 %v839_v14 }
 0x16e   : > { %v810_v24 = vmax.f32 %v696_v19, 0.0  ;;  %v699_v25 = vadd.f32 %v2504_v1, %v698_v23 }
 0x16f   : > { %v813_v50 = vmax.f32 %v707_v22, 0.0  ;;  %v1892_v26 = vpop.f32.mrb[0].mxu1 }
 0x170   : > { %v811_v27 = vmax.f32 %v699_v25, 0.0  ;;  %v752_v28 = vadd.f32 %v1892_v26, %v2504_v1  ;;  %v743_v29 = vpop.f32.mrb[1].mxu1 }
 0x171   : > { %v841_v30 = vpack.c.bf16 %v813_v50, %v812_v21  ;;  %v744_v31 = vadd.f32 %v2504_v1, %v743_v29  ;;  %v1893_v32 = vpop.f32.mrb[2].mxu1 }
 0x172   : > { %v840_v33 = vpack.c.bf16 %v811_v27, %v810_v24  ;;  %v1884_v34 = vpop.f32.mrb[8].mxu0  ;;  %v824_v35 = vmax.f32 %v752_v28, 0.0  ;;  %v755_v36 = vadd.f32 %v1893_v32, %v2504_v1  ;;  %v746_v37 = vpop.f32.mrb[3].mxu1 }
 0x173   : > { %v720_v38 = vadd.f32 %v1884_v34, %v2504_v1  ;;  %v711_v39 = vpop.f32.mrb[9].mxu0  ;;  %v822_v40 = vmax.f32 %v744_v31, 0.0  ;;  %v747_v41 = vadd.f32 %v2504_v1, %v746_v37 }
 0x174   : > { %v712_v42 = vadd.f32 %v2504_v1, %v711_v39  ;;  %v1885_v43 = vpop.f32.mrb[10].mxu0  ;;  %1926 = vmatprep.mubr.bf16.mxu1 %v840_v33  ;;  %v825_v44 = vmax.f32 %v755_v36, 0.0 }
 0x175   : > { %v816_v45 = vmax.f32 %v720_v38, 0.0  ;;  %v723_v46 = vadd.f32 %v1885_v43, %v2504_v1  ;;  %v714_v47 = vpop.f32.mrb[11].mxu0  ;;  %1927 = vmatmul.mubr.bf16.gmra.mrb[20].mxu1 %v841_v30  ;;  %v823_v48 = vmax.f32 %v747_v41, 0.0 }
 0x176   : > { %v814_v49 = vmax.f32 %v712_v42, 0.0  ;;  %v715_v51 = vadd.f32 %v2504_v1, %v714_v47  ;;  %v2522_v52 = vpack.c.bf16 %v825_v44, %v824_v35 }
 0x177   : > { %v817_v53 = vmax.f32 %v723_v46, 0.0  ;;  %v846_v54 = vpack.c.bf16 %v823_v48, %v822_v40  ;;  %v1896_v55 = vpop.f32.mrb[4].mxu1 }
 0x178   : > { %v815_v56 = vmax.f32 %v715_v51, 0.0  ;;  %v768_v57 = vadd.f32 %v1896_v55, %v2504_v1  ;;  %v759_v58 = vpop.f32.mrb[5].mxu1  ;;  %v2111_v51 = vld [vmem:[%s2924_s6 + $0x30] sm:$0xff]  }
 0x179   : > { %v843_v59 = vpack.c.bf16 %v817_v53, %v816_v45  ;;  %v760_v60 = vadd.f32 %v2504_v1, %v759_v58  ;;  %v1897_v61 = vpop.f32.mrb[6].mxu1  ;;  %1966 = vmatprep.subr.bf16.mxu0 %v2111_v51 }
 0x17a   : > { %v842_v62 = vpack.c.bf16 %v815_v56, %v814_v49  ;;  %v1888_v63 = vpop.f32.mrb[12].mxu0  ;;  %v828_v0 = vmax.f32 %v768_v57, 0.0  ;;  %v771_v2 = vadd.f32 %v1897_v61, %v2504_v1  ;;  %v762_v3 = vpop.f32.mrb[7].mxu1  ;;  %1967 = vmatpush3.bf16.msra.mxu0 %v2111_v51 }
 0x17b   : > { %v736_v4 = vadd.f32 %v1888_v63, %v2504_v1  ;;  %v727_v5 = vpop.f32.mrb[13].mxu0  ;;  %v826_v6 = vmax.f32 %v760_v60, 0.0  ;;  %v763_v7 = vadd.f32 %v2504_v1, %v762_v3 }
 0x17c   : > { %v728_v8 = vadd.f32 %v2504_v1, %v727_v5  ;;  %v1889_v9 = vpop.f32.mrb[14].mxu0  ;;  %1930 = vmatprep.mubr.bf16.mxu1 %v842_v62  ;;  %v829_v10 = vmax.f32 %v771_v2, 0.0 }
 0x17d   : > { %v820_v11 = vmax.f32 %v736_v4, 0.0  ;;  %v739_v12 = vadd.f32 %v1889_v9, %v2504_v1  ;;  %v730_v13 = vpop.f32.mrb[15].mxu0  ;;  %1931 = vmatmul.mubr.bf16.gmra.mrb[24].mxu1 %v843_v59  ;;  %v827_v14 = vmax.f32 %v763_v7, 0.0 }
 0x17e   : > { %v818_v15 = vmax.f32 %v728_v8, 0.0  ;;  %v731_v16 = vadd.f32 %v2504_v1, %v730_v13  ;;  %v849_v17 = vpack.c.bf16 %v829_v10, %v828_v0 }
 0x17f   : > { %v821_v18 = vmax.f32 %v739_v12, 0.0  ;;  %v848_v19 = vpack.c.bf16 %v827_v14, %v826_v6  ;;  %v1900_v20 = vpop.f32.mrb[8].mxu1 }
 0x180   : > { %v819_v21 = vmax.f32 %v731_v16, 0.0  ;;  %v784_v22 = vadd.f32 %v1900_v20, %v2504_v1  ;;  %v775_v23 = vpop.f32.mrb[9].mxu1 }
 0x181   : > { %v845_v24 = vpack.c.bf16 %v821_v18, %v820_v11  ;;  %v776_v25 = vadd.f32 %v2504_v1, %v775_v23  ;;  %v1901_v50 = vpop.f32.mrb[10].mxu1 }
 0x182   : > { %v844_v26 = vpack.c.bf16 %v819_v21, %v818_v15  ;;  %v832_v27 = vmax.f32 %v784_v22, 0.0  ;;  %v787_v28 = vadd.f32 %v1901_v50, %v2504_v1  ;;  %v778_v29 = vpop.f32.mrb[11].mxu1 }
 0x183   : > { %v830_v30 = vmax.f32 %v776_v25, 0.0  ;;  %v779_v31 = vadd.f32 %v2504_v1, %v778_v29 }
 0x184   : > { %1934 = vmatprep.mubr.bf16.mxu1 %v844_v26  ;;  %v833_v32 = vmax.f32 %v787_v28, 0.0 }
 0x185   : > { %1935 = vmatmul.mubr.bf16.gmra.mrb[28].mxu1 %v845_v24  ;;  %v831_v33 = vmax.f32 %v779_v31, 0.0 }
 0x186   : > { %1938 = vmatprep.mubr.bf16.mxu1 %v846_v54  ;;  %v851_v34 = vpack.c.bf16 %v833_v32, %v832_v27 }
 0x187   : > { %v850_v35 = vpack.c.bf16 %v831_v33, %v830_v30  ;;  %v1904_v36 = vpop.f32.mrb[12].mxu1 }
 0x188   : > { %v800_v37 = vadd.f32 %v1904_v36, %v2504_v1  ;;  %v791_v38 = vpop.f32.mrb[13].mxu1 }
 0x189   : > { %v792_v39 = vadd.f32 %v2504_v1, %v791_v38  ;;  %v1905_v40 = vpop.f32.mrb[14].mxu1 }
 0x18a   : > { %v836_v41 = vmax.f32 %v800_v37, 0.0  ;;  %v803_v42 = vadd.f32 %v1905_v40, %v2504_v1  ;;  %v794_v43 = vpop.f32.mrb[15].mxu1 }
 0x18b   : > { %v834_v44 = vmax.f32 %v792_v39, 0.0  ;;  %v795_v45 = vadd.f32 %v2504_v1, %v794_v43  ;;  %v2112_v1 = vld [vmem:[%s2924_s6 + $0x38] sm:$0xff]  }
 0x18c   : > { %v837_v46 = vmax.f32 %v803_v42, 0.0  ;;  %1968 = vmatprep.subr.bf16.mxu0 %v2112_v1 }
 0x18d   : > { %1939 = vmatmul.mubr.bf16.gmra.mrb[32].mxu1 %v2522_v52  ;;  %v835_v47 = vmax.f32 %v795_v45, 0.0  ;;  %1969 = vmatpush3.bf16.msra.mxu0 %v2112_v1  ;;  %v2550_v52 = vld [vmem:[%s2923_s5] ss:$0 sm:$0xff] }
 0x18e   : > { %1942 = vmatprep.mubr.bf16.mxu1 %v848_v19  ;;  %v853_v48 = vpack.c.bf16 %v837_v46, %v836_v41 }
 0x18f   : > { %v852_v49 = vpack.c.bf16 %v835_v47, %v834_v44 }
 0x195   : > { %1943 = vmatmul.mubr.bf16.gmra.mrb[36].mxu1 %v849_v17 }
 0x196   : > { %1946 = vmatprep.mubr.bf16.mxu1 %v850_v35 }
 0x19d   : > { %1947 = vmatmul.mubr.bf16.gmra.mrb[40].mxu1 %v851_v34 }
 0x19e   : > { %1950 = vmatprep.mubr.bf16.mxu1 %v852_v49 }
 0x1a5   : > { %1951 = vmatmul.mubr.bf16.gmra.mrb[44].mxu1 %v853_v48 }
 0x240   : > { %v1924_v53 = vpop.f32.mrb[16].mxu1 }
 0x241   : > { %v968_v54 = vadd.f32 %v1924_v53, %v2550_v52  ;;  %v959_v55 = vpop.f32.mrb[17].mxu1 }
 0x242   : > { %v960_v56 = vadd.f32 %v2550_v52, %v959_v55  ;;  %v1925_v57 = vpop.f32.mrb[18].mxu1 }
 0x243   : > { %v971_v58 = vadd.f32 %v1925_v57, %v2550_v52  ;;  %v962_v59 = vpop.f32.mrb[19].mxu1  ;;  %v1088_v61 = vmax.f32 %v968_v54, 0.0 }
 0x244   : > { %v963_v60 = vadd.f32 %v2550_v52, %v962_v59  ;;  %v1086_v63 = vmax.f32 %v960_v56, 0.0 }
 0x245   : > { %v1089_v62 = vmax.f32 %v971_v58, 0.0 }
 0x246   : > { %v1087_v0 = vmax.f32 %v963_v60, 0.0 }
 0x247   : > { %v1119_v2 = vpack.c.bf16 %v1089_v62, %v1088_v61 }
 0x248   : > { %v1118_v3 = vpack.c.bf16 %v1087_v0, %v1086_v63  ;;  %v1928_v4 = vpop.f32.mrb[20].mxu1 }
 0x249   : > { %v984_v5 = vadd.f32 %v1928_v4, %v2550_v52  ;;  %v975_v6 = vpop.f32.mrb[21].mxu1 }
 0x24a   : > { %v976_v7 = vadd.f32 %v2550_v52, %v975_v6  ;;  %v1929_v8 = vpop.f32.mrb[22].mxu1  ;;  %1970 = vmatprep.mubr.bf16.mxu0 %v1118_v3 }
 0x24b   : > { %v1092_v9 = vmax.f32 %v984_v5, 0.0  ;;  %v987_v10 = vadd.f32 %v1929_v8, %v2550_v52  ;;  %v978_v11 = vpop.f32.mrb[23].mxu1  ;;  %1971 = vmatmul.mubr.bf16.vlgmr.msra.gmra.mrb[16].mxu0 %v1119_v2 }
 0x24c   : > { %v979_v12 = vadd.f32 %v2550_v52, %v978_v11  ;;  %v1090_v14 = vmax.f32 %v976_v7, 0.0 }
 0x24d   : > { %v1093_v13 = vmax.f32 %v987_v10, 0.0 }
 0x24e   : > { %v1091_v15 = vmax.f32 %v979_v12, 0.0 }
 0x24f   : > { %v1121_v16 = vpack.c.bf16 %v1093_v13, %v1092_v9 }
 0x250   : > { %v1120_v17 = vpack.c.bf16 %v1091_v15, %v1090_v14  ;;  %v1932_v18 = vpop.f32.mrb[24].mxu1 }
 0x251   : > { %v1000_v19 = vadd.f32 %v1932_v18, %v2550_v52  ;;  %v991_v20 = vpop.f32.mrb[25].mxu1 }
 0x252   : > { %v992_v21 = vadd.f32 %v2550_v52, %v991_v20  ;;  %v1933_v22 = vpop.f32.mrb[26].mxu1  ;;  %1974 = vmatprep.mubr.bf16.mxu0 %v1120_v17 }
 0x253   : > { %v1096_v23 = vmax.f32 %v1000_v19, 0.0  ;;  %v1003_v24 = vadd.f32 %v1933_v22, %v2550_v52  ;;  %v994_v25 = vpop.f32.mrb[27].mxu1  ;;  %1975 = vmatmul.mubr.bf16.gmra.mrb[20].mxu0 %v1121_v16 }
 0x254   : > { %v995_v50 = vadd.f32 %v2550_v52, %v994_v25  ;;  %v1094_v27 = vmax.f32 %v992_v21, 0.0 }
 0x255   : > { %v1097_v26 = vmax.f32 %v1003_v24, 0.0 }
 0x256   : > { %v1095_v28 = vmax.f32 %v995_v50, 0.0 }
 0x257   : > { %v1123_v29 = vpack.c.bf16 %v1097_v26, %v1096_v23 }
 0x258   : > { %v1122_v30 = vpack.c.bf16 %v1095_v28, %v1094_v27  ;;  %v1936_v31 = vpop.f32.mrb[28].mxu1 }
 0x259   : > { %v1016_v32 = vadd.f32 %v1936_v31, %v2550_v52  ;;  %v1007_v33 = vpop.f32.mrb[29].mxu1 }
 0x25a   : > { %v1008_v34 = vadd.f32 %v2550_v52, %v1007_v33  ;;  %v1937_v35 = vpop.f32.mrb[30].mxu1  ;;  %1978 = vmatprep.mubr.bf16.mxu0 %v1122_v30 }
 0x25b   : > { %v1100_v36 = vmax.f32 %v1016_v32, 0.0  ;;  %v1019_v37 = vadd.f32 %v1937_v35, %v2550_v52  ;;  %v1010_v38 = vpop.f32.mrb[31].mxu1  ;;  %1979 = vmatmul.mubr.bf16.gmra.mrb[24].mxu0 %v1123_v29 }
 0x25c   : > { %v1011_v39 = vadd.f32 %v2550_v52, %v1010_v38  ;;  %v1098_v41 = vmax.f32 %v1008_v34, 0.0  ;;  %v2587_v38 = vld [vmem:[%s2925_s7] ss:$0 sm:$0xff] }
 0x25d   : > { %v1101_v40 = vmax.f32 %v1019_v37, 0.0 }
 0x25e   : > { %v1099_v42 = vmax.f32 %v1011_v39, 0.0 }
 0x25f   : > { %v1125_v43 = vpack.c.bf16 %v1101_v40, %v1100_v36 }
 0x260   : > { %v1124_v44 = vpack.c.bf16 %v1099_v42, %v1098_v41  ;;  %v1940_v45 = vpop.f32.mrb[32].mxu1 }
 0x261   : > { %v1032_v46 = vadd.f32 %v1940_v45, %v2550_v52  ;;  %v1023_v47 = vpop.f32.mrb[33].mxu1 }
 0x262   : > { %v1024_v48 = vadd.f32 %v2550_v52, %v1023_v47  ;;  %v1941_v49 = vpop.f32.mrb[34].mxu1  ;;  %1982 = vmatprep.mubr.bf16.mxu0 %v1124_v44 }
 0x263   : > { %v1104_v51 = vmax.f32 %v1032_v46, 0.0  ;;  %v1035_v1 = vadd.f32 %v1941_v49, %v2550_v52  ;;  %v1026_v53 = vpop.f32.mrb[35].mxu1  ;;  %1983 = vmatmul.mubr.bf16.gmra.mrb[28].mxu0 %v1125_v43 }
 0x264   : > { %v1027_v54 = vadd.f32 %v2550_v52, %v1026_v53  ;;  %v1102_v56 = vmax.f32 %v1024_v48, 0.0 }
 0x265   : > { %v1105_v55 = vmax.f32 %v1035_v1, 0.0 }
 0x266   : > { %v1103_v57 = vmax.f32 %v1027_v54, 0.0 }
 0x267   : > { %v1127_v58 = vpack.c.bf16 %v1105_v55, %v1104_v51 }
 0x268   : > { %v1126_v59 = vpack.c.bf16 %v1103_v57, %v1102_v56  ;;  %v1944_v60 = vpop.f32.mrb[36].mxu1 }
 0x269   : > { %v1048_v61 = vadd.f32 %v1944_v60, %v2550_v52  ;;  %v1039_v62 = vpop.f32.mrb[37].mxu1 }
 0x26a   : > { %v1040_v63 = vadd.f32 %v2550_v52, %v1039_v62  ;;  %v1945_v0 = vpop.f32.mrb[38].mxu1  ;;  %1986 = vmatprep.mubr.bf16.mxu0 %v1126_v59 }
 0x26b   : > { %v1108_v2 = vmax.f32 %v1048_v61, 0.0  ;;  %v1051_v3 = vadd.f32 %v1945_v0, %v2550_v52  ;;  %v1042_v4 = vpop.f32.mrb[39].mxu1  ;;  %1987 = vmatmul.mubr.bf16.gmra.mrb[32].mxu0 %v1127_v58 }
 0x26c   : > { %v1043_v5 = vadd.f32 %v2550_v52, %v1042_v4  ;;  %v1106_v7 = vmax.f32 %v1040_v63, 0.0 }
 0x26d   : > { %v1109_v6 = vmax.f32 %v1051_v3, 0.0 }
 0x26e   : > { %v1107_v8 = vmax.f32 %v1043_v5, 0.0 }
 0x26f   : > { %v1129_v9 = vpack.c.bf16 %v1109_v6, %v1108_v2 }
 0x270   : > { %v1128_v10 = vpack.c.bf16 %v1107_v8, %v1106_v7  ;;  %v1948_v11 = vpop.f32.mrb[40].mxu1 }
 0x271   : > { %v1064_v12 = vadd.f32 %v1948_v11, %v2550_v52  ;;  %v1055_v13 = vpop.f32.mrb[41].mxu1 }
 0x272   : > { %v1056_v14 = vadd.f32 %v2550_v52, %v1055_v13  ;;  %v1949_v15 = vpop.f32.mrb[42].mxu1  ;;  %1990 = vmatprep.mubr.bf16.mxu0 %v1128_v10 }
 0x273   : > { %v1112_v16 = vmax.f32 %v1064_v12, 0.0  ;;  %v1067_v17 = vadd.f32 %v1949_v15, %v2550_v52  ;;  %v1058_v18 = vpop.f32.mrb[43].mxu1  ;;  %1991 = vmatmul.mubr.bf16.gmra.mrb[36].mxu0 %v1129_v9 }
 0x274   : > { %v1059_v19 = vadd.f32 %v2550_v52, %v1058_v18  ;;  %v1110_v21 = vmax.f32 %v1056_v14, 0.0 }
 0x275   : > { %v1113_v20 = vmax.f32 %v1067_v17, 0.0 }
 0x276   : > { %v1111_v22 = vmax.f32 %v1059_v19, 0.0 }
 0x277   : > { %v1131_v23 = vpack.c.bf16 %v1113_v20, %v1112_v16 }
 0x278   : > { %v1130_v24 = vpack.c.bf16 %v1111_v22, %v1110_v21  ;;  %v1952_v25 = vpop.f32.mrb[44].mxu1 }
 0x279   : > { %v1080_v50 = vadd.f32 %v1952_v25, %v2550_v52  ;;  %v1071_v26 = vpop.f32.mrb[45].mxu1 }
 0x27a   : > { %v1072_v27 = vadd.f32 %v2550_v52, %v1071_v26  ;;  %v1953_v28 = vpop.f32.mrb[46].mxu1  ;;  %1994 = vmatprep.mubr.bf16.mxu0 %v1130_v24 }
 0x27b   : > { %v1116_v29 = vmax.f32 %v1080_v50, 0.0  ;;  %v1083_v30 = vadd.f32 %v1953_v28, %v2550_v52  ;;  %v1074_v31 = vpop.f32.mrb[47].mxu1  ;;  %1995 = vmatmul.mubr.bf16.gmra.mrb[40].mxu0 %v1131_v23 }
 0x27c   : > { %v1075_v32 = vadd.f32 %v2550_v52, %v1074_v31  ;;  %v1114_v34 = vmax.f32 %v1072_v27, 0.0 }
 0x27d   : > { %v1117_v33 = vmax.f32 %v1083_v30, 0.0 }
 0x27e   : > { %v1115_v35 = vmax.f32 %v1075_v32, 0.0 }
 0x27f   : > { %v1133_v36 = vpack.c.bf16 %v1117_v33, %v1116_v29 }
 0x280   : > { %v1132_v37 = vpack.c.bf16 %v1115_v35, %v1114_v34 }
 0x282   : > { %1998 = vmatprep.mubr.bf16.mxu0 %v1132_v37 }
 0x283   : > { %1999 = vmatmul.mubr.bf16.gmra.mrb[44].mxu0 %v1133_v36 }
 0x31e   : > { %v1972_v39 = vpop.f32.mrb[16].mxu0 }
 0x31f   : > { %v2590_v40 = vadd.f32 %v1972_v39, %v2587_v38  ;;  %v1239_v41 = vpop.f32.mrb[17].mxu0 }
 0x320   : > { %v1973_v42 = vpop.f32.mrb[18].mxu0  ;;  %v2597_v44 = vadd.f32 %v2587_v38, %v1239_v41 }
 0x321   : > { %1370 = vmax.xlane.f32.xlu0 %v2590_v40  ;;  %v1242_v52 = vpop.f32.mrb[19].mxu0  ;;  %v2602_v46 = vadd.f32 %v1973_v42, %v2587_v38 }
 0x322   : > { %v2594_v43 = vadd.f32 %v2587_v38, %v1242_v52 }
 0x324   : > { %1368 = vmax.xlane.f32.xlu1 %v2594_v43 }
 0x325   : > { %1366 = vmax.xlane.f32.xlu0 %v2597_v44 }
 0x326   : > { %v1976_v45 = vpop.f32.mrb[20].mxu0 }
 0x327   : > { %v2605_v47 = vadd.f32 %v1976_v45, %v2587_v38  ;;  %v1255_v48 = vpop.f32.mrb[21].mxu0 }
 0x328   : > { %v1977_v49 = vpop.f32.mrb[22].mxu0  ;;  %v2610_v1 = vadd.f32 %v2587_v38, %v1255_v48 }
 0x329   : > { %v1258_v51 = vpop.f32.mrb[23].mxu0  ;;  %1378 = vmax.xlane.f32.xlu1 %v2605_v47  ;;  %1372 = vmax.xlane.f32.xlu0 %v2602_v46  ;;  %v2613_v53 = vadd.f32 %v1977_v49, %v2587_v38 }
 0x32a   : > { %v2618_v55 = vadd.f32 %v2587_v38, %v1258_v51 }
 0x32d   : > { %1374 = vmax.xlane.f32.xlu1 %v2610_v1  ;;  %1380 = vmax.xlane.f32.xlu0 %v2613_v53 }
 0x32e   : > { %v1980_v54 = vpop.f32.mrb[24].mxu0 }
 0x32f   : > { %v2621_v56 = vadd.f32 %v1980_v54, %v2587_v38  ;;  %v1271_v57 = vpop.f32.mrb[25].mxu0 }
 0x330   : > { %v1981_v58 = vpop.f32.mrb[26].mxu0  ;;  %v2626_v60 = vadd.f32 %v2587_v38, %v1271_v57 }
 0x331   : > { %v1274_v59 = vpop.f32.mrb[27].mxu0  ;;  %1386 = vmax.xlane.f32.xlu1 %v2621_v56  ;;  %1376 = vmax.xlane.f32.xlu0 %v2618_v55  ;;  %v2629_v61 = vadd.f32 %v1981_v58, %v2587_v38 }
 0x332   : > { %v2634_v63 = vadd.f32 %v2587_v38, %v1274_v59 }
 0x335   : > { %1382 = vmax.xlane.f32.xlu1 %v2626_v60  ;;  %1388 = vmax.xlane.f32.xlu0 %v2629_v61 }
 0x336   : > { %v1984_v62 = vpop.f32.mrb[28].mxu0 }
 0x337   : > { %v2637_v0 = vadd.f32 %v1984_v62, %v2587_v38  ;;  %v1287_v2 = vpop.f32.mrb[29].mxu0 }
 0x338   : > { %v1985_v3 = vpop.f32.mrb[30].mxu0  ;;  %v2642_v5 = vadd.f32 %v2587_v38, %v1287_v2 }
 0x339   : > { %v1290_v4 = vpop.f32.mrb[31].mxu0  ;;  %1394 = vmax.xlane.f32.xlu1 %v2637_v0  ;;  %1384 = vmax.xlane.f32.xlu0 %v2634_v63  ;;  %v2645_v6 = vadd.f32 %v1985_v3, %v2587_v38 }
 0x33a   : > { %v2650_v8 = vadd.f32 %v2587_v38, %v1290_v4 }
 0x33d   : > { %1390 = vmax.xlane.f32.xlu1 %v2642_v5  ;;  %1396 = vmax.xlane.f32.xlu0 %v2645_v6 }
 0x33e   : > { %v1988_v7 = vpop.f32.mrb[32].mxu0 }
 0x33f   : > { %v2653_v9 = vadd.f32 %v1988_v7, %v2587_v38  ;;  %v1303_v10 = vpop.f32.mrb[33].mxu0 }
 0x340   : > { %v1989_v11 = vpop.f32.mrb[34].mxu0  ;;  %v2658_v13 = vadd.f32 %v2587_v38, %v1303_v10 }
 0x341   : > { %v1306_v12 = vpop.f32.mrb[35].mxu0  ;;  %1402 = vmax.xlane.f32.xlu1 %v2653_v9  ;;  %1392 = vmax.xlane.f32.xlu0 %v2650_v8  ;;  %v2661_v14 = vadd.f32 %v1989_v11, %v2587_v38 }
 0x342   : > { %v2666_v16 = vadd.f32 %v2587_v38, %v1306_v12 }
 0x345   : > { %1398 = vmax.xlane.f32.xlu1 %v2658_v13  ;;  %1404 = vmax.xlane.f32.xlu0 %v2661_v14 }
 0x346   : > { %v1992_v15 = vpop.f32.mrb[36].mxu0 }
 0x347   : > { %v2669_v17 = vadd.f32 %v1992_v15, %v2587_v38  ;;  %v1319_v18 = vpop.f32.mrb[37].mxu0 }
 0x348   : > { %v1993_v19 = vpop.f32.mrb[38].mxu0  ;;  %v2674_v21 = vadd.f32 %v2587_v38, %v1319_v18 }
 0x349   : > { %v1322_v20 = vpop.f32.mrb[39].mxu0  ;;  %1410 = vmax.xlane.f32.xlu1 %v2669_v17  ;;  %1400 = vmax.xlane.f32.xlu0 %v2666_v16  ;;  %v2677_v22 = vadd.f32 %v1993_v19, %v2587_v38 }
 0x34a   : > { %v2682_v24 = vadd.f32 %v2587_v38, %v1322_v20 }
 0x34d   : > { %1406 = vmax.xlane.f32.xlu1 %v2674_v21  ;;  %1412 = vmax.xlane.f32.xlu0 %v2677_v22 }
 0x34e   : > { %v1996_v23 = vpop.f32.mrb[40].mxu0 }
 0x34f   : > { %v2685_v25 = vadd.f32 %v1996_v23, %v2587_v38  ;;  %v1335_v50 = vpop.f32.mrb[41].mxu0 }
 0x350   : > { %v1997_v26 = vpop.f32.mrb[42].mxu0  ;;  %v2690_v28 = vadd.f32 %v2587_v38, %v1335_v50 }
 0x351   : > { %v1338_v27 = vpop.f32.mrb[43].mxu0  ;;  %1418 = vmax.xlane.f32.xlu1 %v2685_v25  ;;  %1408 = vmax.xlane.f32.xlu0 %v2682_v24  ;;  %v2693_v29 = vadd.f32 %v1997_v26, %v2587_v38 }
 0x352   : > { %v2698_v31 = vadd.f32 %v2587_v38, %v1338_v27 }
 0x355   : > { %1414 = vmax.xlane.f32.xlu1 %v2690_v28  ;;  %1420 = vmax.xlane.f32.xlu0 %v2693_v29 }
 0x356   : > { %v2000_v30 = vpop.f32.mrb[44].mxu0 }
 0x357   : > { %v1351_v32 = vpop.f32.mrb[45].mxu0  ;;  %v2712_v39 = vadd.f32 %v2000_v30, %v2587_v38 }
 0x358   : > { %v2701_v33 = vadd.f32 %v2587_v38, %v1351_v32  ;;  %v2001_v34 = vpop.f32.mrb[46].mxu0 }
 0x359   : > { %v2704_v35 = vadd.f32 %v2001_v34, %v2587_v38  ;;  %v1354_v36 = vpop.f32.mrb[47].mxu0  ;;  %1416 = vmax.xlane.f32.xlu0 %v2698_v31 }
 0x35a   : > { %v2708_v37 = vadd.f32 %v2587_v38, %v1354_v36  ;;  %1422 = vmax.xlane.f32.xlu1 %v2701_v33 }
 0x35d   : > { %1424 = vmax.xlane.f32.xlu0 %v2708_v37 }
 0x35e   : > { %1426 = vmax.xlane.f32.xlu1 %v2712_v39 }
 0x361   : > { %1428 = vmax.xlane.f32.xlu0 %v2704_v35 }
 0x3ae   : > { %v1371_v41 = vpop.xlane.xlu0 %1370 }
 0x3af   : > { %v1432_v42 = vsub.f32 %v2590_v40, %v1371_v41 }
 0x3b1   : > { %v1466_v52 = vmul.f32 1.442695, %v1432_v42  ;;  %v1369_v45 = vpop.xlane.xlu1 %1368 }
 0x3b2   : > { %v1367_v48 = vpop.xlane.xlu0 %1366  ;;  %v1431_v59 = vsub.f32 %v2594_v43, %v1369_v45 }
 0x3b3   : > { %2113 = vpow2.f32 %v1466_v52  ;;  %v1430_v49 = vsub.f32 %v2597_v44, %v1367_v48 }
 0x3b4   : > { %v1464_v7 = vmul.f32 1.442695, %v1431_v59 }
 0x3b5   : > { %v1462_v51 = vmul.f32 1.442695, %v1430_v49 }
 0x3b6   : > { %v1379_v54 = vpop.xlane.xlu1 %1378  ;;  %v1373_v57 = vpop.xlane.xlu0 %1372 }
 0x3b7   : > { %2115 = vpow2.f32 %v1462_v51  ;;  %v1436_v38 = vsub.f32 %v2605_v47, %v1379_v54  ;;  %v1433_v58 = vsub.f32 %v2602_v46, %v1373_v57 }
 0x3b9   : > { %v1474_v62 = vmul.f32 1.442695, %v1436_v38  ;;  %v1468_v2 = vmul.f32 1.442695, %v1433_v58 }
 0x3ba   : > { %v1375_v3 = vpop.xlane.xlu1 %1374  ;;  %v1381_v40 = vpop.xlane.xlu0 %1380 }
 0x3bb   : > { %2117 = vpow2.f32 %v1474_v62  ;;  %v1434_v4 = vsub.f32 %v2610_v1, %v1375_v3  ;;  %v1437_v44 = vsub.f32 %v2613_v53, %v1381_v40 }
 0x3bc   : > { %2119 = vpow2.f32 %v1468_v2 }
 0x3bd   : > { %v2724_v10 = vpop.eup %2113  ;;  %v1470_v11 = vmul.f32 1.442695, %v1434_v4  ;;  %v1476_v12 = vmul.f32 1.442695, %v1437_v44 }
 0x3be   : > { %1530 = vadd.xlane.f32.xlu1 %v2724_v10  ;;  %v1387_v47 = vpop.xlane.xlu1 %1386  ;;  %v1377_v46 = vpop.xlane.xlu0 %1376 }
 0x3bf   : > { %2121 = vpow2.f32 %v1470_v11  ;;  %v1440_v43 = vsub.f32 %v2621_v56, %v1387_v47  ;;  %v1435_v15 = vsub.f32 %v2618_v55, %v1377_v46 }
 0x3c0   : > { %2123 = vpow2.f32 %v1464_v7 }
 0x3c1   : > { %v2729_v18 = vpop.eup %2115  ;;  %v1482_v1 = vmul.f32 1.442695, %v1440_v43  ;;  %v1472_v23 = vmul.f32 1.442695, %v1435_v15 }
 0x3c2   : > { %v1383_v19 = vpop.xlane.xlu1 %1382  ;;  %1526 = vadd.xlane.f32.xlu1 %v2729_v18  ;;  %v1389_v53 = vpop.xlane.xlu0 %1388 }
 0x3c3   : > { %2125 = vpow2.f32 %v1482_v1  ;;  %v1438_v20 = vsub.f32 %v2626_v60, %v1383_v19  ;;  %v1441_v50 = vsub.f32 %v2629_v61, %v1389_v53 }
 0x3c4   : > { %2127 = vpow2.f32 %v1476_v12 }
 0x3c5   : > { %v2734_v26 = vpop.eup %2117  ;;  %v1478_v56 = vmul.f32 1.442695, %v1438_v20  ;;  %v1484_v60 = vmul.f32 1.442695, %v1441_v50 }
 0x3c6   : > { %v2736_v27 = vpop.eup %2119  ;;  %v1395_v55 = vpop.xlane.xlu1 %1394  ;;  %1538 = vadd.xlane.f32.xlu1 %v2734_v26 }
 0x3c7   : > { %v1385_v30 = vpop.xlane.xlu0 %1384  ;;  %2129 = vpow2.f32 %v1478_v56  ;;  %v1444_v32 = vsub.f32 %v2637_v0, %v1395_v55  ;;  %1532 = vadd.xlane.f32.xlu0 %v2736_v27 }
 0x3c8   : > { %2131 = vpow2.f32 %v1472_v23  ;;  %v1439_v34 = vsub.f32 %v2634_v63, %v1385_v30 }
 0x3c9   : > { %v2742_v36 = vpop.eup %2121  ;;  %v1490_v61 = vmul.f32 1.442695, %v1444_v32 }
 0x3ca   : > { %v2744_v41 = vpop.eup %2123  ;;  %v1391_v42 = vpop.xlane.xlu1 %1390  ;;  %1534 = vadd.xlane.f32.xlu1 %v2742_v36  ;;  %v1480_v0 = vmul.f32 1.442695, %v1439_v34 }
 0x3cb   : > { %v1397_v52 = vpop.xlane.xlu0 %1396  ;;  %2133 = vpow2.f32 %v1490_v61  ;;  %v1442_v45 = vsub.f32 %v2642_v5, %v1391_v42  ;;  %1528 = vadd.xlane.f32.xlu0 %v2744_v41 }
 0x3cc   : > { %2135 = vpow2.f32 %v1484_v60  ;;  %v1445_v48 = vsub.f32 %v2645_v6, %v1397_v52 }
 0x3cd   : > { %v2750_v49 = vpop.eup %2125  ;;  %v1486_v63 = vmul.f32 1.442695, %v1442_v45 }
 0x3ce   : > { %v2752_v51 = vpop.eup %2127  ;;  %v1403_v54 = vpop.xlane.xlu1 %1402  ;;  %1546 = vadd.xlane.f32.xlu1 %v2750_v49  ;;  %v1492_v5 = vmul.f32 1.442695, %v1445_v48 }
 0x3cf   : > { %v1393_v57 = vpop.xlane.xlu0 %1392  ;;  %2137 = vpow2.f32 %v1486_v63  ;;  %v1448_v38 = vsub.f32 %v2653_v9, %v1403_v54  ;;  %1540 = vadd.xlane.f32.xlu0 %v2752_v51 }
 0x3d0   : > { %2139 = vpow2.f32 %v1480_v0  ;;  %v1443_v58 = vsub.f32 %v2650_v8, %v1393_v57 }
 0x3d1   : > { %v2758_v59 = vpop.eup %2129  ;;  %v1498_v6 = vmul.f32 1.442695, %v1448_v38 }
 0x3d2   : > { %v2760_v62 = vpop.eup %2131  ;;  %v1399_v2 = vpop.xlane.xlu1 %1398  ;;  %1542 = vadd.xlane.f32.xlu1 %v2758_v59  ;;  %v1488_v9 = vmul.f32 1.442695, %v1443_v58 }
 0x3d3   : > { %v1405_v3 = vpop.xlane.xlu0 %1404  ;;  %2141 = vpow2.f32 %v1498_v6  ;;  %v1446_v40 = vsub.f32 %v2658_v13, %v1399_v2  ;;  %1536 = vadd.xlane.f32.xlu0 %v2760_v62 }
 0x3d4   : > { %2143 = vpow2.f32 %v1492_v5  ;;  %v1449_v4 = vsub.f32 %v2661_v14, %v1405_v3 }
 0x3d5   : > { %v2766_v7 = vpop.eup %2133  ;;  %v1494_v8 = vmul.f32 1.442695, %v1446_v40 }
 0x3d6   : > { %v2768_v44 = vpop.eup %2135  ;;  %v1411_v11 = vpop.xlane.xlu1 %1410  ;;  %1554 = vadd.xlane.f32.xlu1 %v2766_v7  ;;  %v1500_v13 = vmul.f32 1.442695, %v1449_v4 }
 0x3d7   : > { %v1401_v47 = vpop.xlane.xlu0 %1400  ;;  %2145 = vpow2.f32 %v1494_v8  ;;  %v1452_v46 = vsub.f32 %v2669_v17, %v1411_v11  ;;  %1548 = vadd.xlane.f32.xlu0 %v2768_v44 }
 0x3d8   : > { %2147 = vpow2.f32 %v1488_v9  ;;  %v1447_v43 = vsub.f32 %v2666_v16, %v1401_v47 }
 0x3d9   : > { %v2774_v12 = vpop.eup %2137  ;;  %v1506_v14 = vmul.f32 1.442695, %v1452_v46 }
 0x3da   : > { %v2776_v15 = vpop.eup %2139  ;;  %v1407_v1 = vpop.xlane.xlu1 %1406  ;;  %1550 = vadd.xlane.f32.xlu1 %v2774_v12  ;;  %v1496_v17 = vmul.f32 1.442695, %v1447_v43 }
 0x3db   : > { %v1413_v19 = vpop.xlane.xlu0 %1412  ;;  %2149 = vpow2.f32 %v1506_v14  ;;  %v1450_v53 = vsub.f32 %v2674_v21, %v1407_v1  ;;  %1544 = vadd.xlane.f32.xlu0 %v2776_v15 }
 0x3dc   : > { %2151 = vpow2.f32 %v1500_v13  ;;  %v1453_v20 = vsub.f32 %v2677_v22, %v1413_v19 }
 0x3dd   : > { %v2782_v23 = vpop.eup %2141  ;;  %v1502_v16 = vmul.f32 1.442695, %v1450_v53 }
 0x3de   : > { %v2784_v50 = vpop.eup %2143  ;;  %v1419_v56 = vpop.xlane.xlu1 %1418  ;;  %1562 = vadd.xlane.f32.xlu1 %v2782_v23  ;;  %v1508_v21 = vmul.f32 1.442695, %v1453_v20 }
 0x3df   : > { %v1409_v55 = vpop.xlane.xlu0 %1408  ;;  %2153 = vpow2.f32 %v1502_v16  ;;  %v1456_v30 = vsub.f32 %v2685_v25, %v1419_v56  ;;  %1556 = vadd.xlane.f32.xlu0 %v2784_v50 }
 0x3e0   : > { %2155 = vpow2.f32 %v1496_v17  ;;  %v1451_v32 = vsub.f32 %v2682_v24, %v1409_v55 }
 0x3e1   : > { %v2790_v60 = vpop.eup %2145  ;;  %v1514_v22 = vmul.f32 1.442695, %v1456_v30 }
 0x3e2   : > { %v2792_v34 = vpop.eup %2147  ;;  %v1415_v61 = vpop.xlane.xlu1 %1414  ;;  %1558 = vadd.xlane.f32.xlu1 %v2790_v60  ;;  %v1504_v45 = vmul.f32 1.442695, %v1451_v32 }
 0x3e3   : > { %v1421_v42 = vpop.xlane.xlu0 %1420  ;;  %2157 = vpow2.f32 %v1514_v22  ;;  %v1454_v52 = vsub.f32 %v2690_v28, %v1415_v61  ;;  %1552 = vadd.xlane.f32.xlu0 %v2792_v34 }
 0x3e4   : > { %v1457_v25 = vsub.f32 %v2693_v29, %v1421_v42  ;;  %2159 = vpow2.f32 %v1508_v21 }
 0x3e5   : > { %v2798_v0 = vpop.eup %2149  ;;  %v1510_v24 = vmul.f32 1.442695, %v1454_v52 }
 0x3e6   : > { %v2800_v48 = vpop.eup %2151  ;;  %1570 = vadd.xlane.f32.xlu1 %v2798_v0  ;;  %v1516_v54 = vmul.f32 1.442695, %v1457_v25 }
 0x3e7   : > { %v1417_v63 = vpop.xlane.xlu0 %1416  ;;  %2161 = vpow2.f32 %v1510_v24  ;;  %1564 = vadd.xlane.f32.xlu0 %v2800_v48  ;;  %v1423_v57 = vpop.xlane.xlu1 %1422 }
 0x3e8   : > { %v1455_v28 = vsub.f32 %v2698_v31, %v1417_v63  ;;  %2163 = vpow2.f32 %v1504_v45  ;;  %v1458_v29 = vsub.f32 %v2701_v33, %v1423_v57 }
 0x3e9   : > { %v2806_v38 = vpop.eup %2153  ;;  %2165 = vpow2.f32 %v1516_v54 }
 0x3ea   : > { %v2808_v5 = vpop.eup %2155  ;;  %v1518_v58 = vmul.f32 1.442695, %v1458_v29  ;;  %1566 = vadd.xlane.f32.xlu1 %v2806_v38  ;;  %v1512_v2 = vmul.f32 1.442695, %v1455_v28 }
 0x3eb   : > { %v1425_v6 = vpop.xlane.xlu0 %1424  ;;  %1560 = vadd.xlane.f32.xlu0 %v2808_v5  ;;  %v1427_v3 = vpop.xlane.xlu1 %1426 }
 0x3ec   : > { %2167 = vpow2.f32 %v1518_v58  ;;  %v1459_v31 = vsub.f32 %v2708_v37, %v1425_v6  ;;  %v1460_v40 = vsub.f32 %v2712_v39, %v1427_v3 }
 0x3ed   : > { %v2814_v9 = vpop.eup %2157  ;;  %2169 = vpow2.f32 %v1512_v2 }
 0x3ee   : > { %v2816_v33 = vpop.eup %2159  ;;  %v1522_v4 = vmul.f32 1.442695, %v1460_v40  ;;  %1578 = vadd.xlane.f32.xlu1 %v2814_v9  ;;  %v1520_v11 = vmul.f32 1.442695, %v1459_v31 }
 0x3ef   : > { %v1429_v8 = vpop.xlane.xlu0 %1428  ;;  %1572 = vadd.xlane.f32.xlu0 %v2816_v33 }
 0x3f0   : > { %2171 = vpow2.f32 %v1522_v4  ;;  %v1461_v47 = vsub.f32 %v2704_v35, %v1429_v8 }
 0x3f1   : > { %v2821_v46 = vpop.eup %2161  ;;  %2173 = vpow2.f32 %v1520_v11 }
 0x3f2   : > { %v2823_v37 = vpop.eup %2163  ;;  %1574 = vadd.xlane.f32.xlu1 %v2821_v46  ;;  %v1524_v39 = vmul.f32 1.442695, %v1461_v47 }
 0x3f3   : > { %1568 = vadd.xlane.f32.xlu0 %v2823_v37  ;;  %v2827_v13 = vpop.eup %2165 }
 0x3f4   : > { %2175 = vpow2.f32 %v1524_v39 }
 0x3f6   : > { %v2829_v43 = vpop.eup %2167 }
 0x3f7   : > { %1580 = vadd.xlane.f32.xlu0 %v2827_v13  ;;  %1582 = vadd.xlane.f32.xlu1 %v2829_v43  ;;  %v2833_v35 = vpop.eup %2169 }
 0x3fa   : > { %v2835_v14 = vpop.eup %2171 }
 0x3fb   : > { %1576 = vadd.xlane.f32.xlu0 %v2833_v35  ;;  %1586 = vadd.xlane.f32.xlu1 %v2835_v14  ;;  %v2839_v1 = vpop.eup %2173 }
 0x3fe   : > { %v2842_v19 = vpop.eup %2175 }
 0x3ff   : > { %1584 = vadd.xlane.f32.xlu0 %v2839_v1 }
 0x403   : > { %1588 = vadd.xlane.f32.xlu0 %v2842_v19 }
 0x44b   : > { %v1531_v53 = vpop.xlane.xlu1 %1530 }
 0x44c   : > { %2177 = vrcp.f32 %v1531_v53 }
 0x44f   : > { %v1527_v17 = vpop.xlane.xlu1 %1526 }
 0x450   : > { %2179 = vrcp.f32 %v1527_v17 }
 0x453   : > { %v1539_v20 = vpop.xlane.xlu1 %1538 }
 0x454   : > { %2181 = vrcp.f32 %v1539_v20  ;;  %v1533_v16 = vpop.xlane.xlu0 %1532 }
 0x455   : > { %2183 = vrcp.f32 %v1533_v16 }
 0x456   : > { %v2178_v56 = vpop.eup %2177 }
 0x457   : > { %v1624_v55 = vmul.f32 %v2178_v56, %v2724_v10  ;;  %v1535_v30 = vpop.xlane.xlu1 %1534 }
 0x458   : > { %2185 = vrcp.f32 %v1535_v30  ;;  %v1529_v21 = vpop.xlane.xlu0 %1528 }
 0x459   : > { %1656 = vst [vmem:[%s2849_s20 + $0x10] sm:$0xff] %v1624_v55  ;;  %2187 = vrcp.f32 %v1529_v21 }
 0x45a   : > { %v2180_v32 = vpop.eup %2179 }
 0x45b   : > { %v1622_v22 = vmul.f32 %v2180_v32, %v2729_v18  ;;  %v1547_v61 = vpop.xlane.xlu1 %1546 }
 0x45c   : > { %2189 = vrcp.f32 %v1547_v61  ;;  %v1541_v42 = vpop.xlane.xlu0 %1540 }
 0x45d   : > { %1654 = vst [vmem:[%s2849_s20] sm:$0xff] %v1622_v22  ;;  %2191 = vrcp.f32 %v1541_v42 }
 0x45e   : > { %v2182_v52 = vpop.eup %2181 }
 0x45f   : > { %v2184_v25 = vpop.eup %2183  ;;  %v1628_v10 = vmul.f32 %v2182_v52, %v2734_v26  ;;  %v1543_v45 = vpop.xlane.xlu1 %1542 }
 0x460   : > { %v1625_v24 = vmul.f32 %v2184_v25, %v2736_v27  ;;  %2193 = vrcp.f32 %v1543_v45  ;;  %v1537_v63 = vpop.xlane.xlu0 %1536 }
 0x461   : > { %1660 = vst [vmem:[%s2849_s20 + $0x30] sm:$0xff] %v1628_v10  ;;  %2195 = vrcp.f32 %v1537_v63 }
 0x462   : > { %v2186_v18 = vpop.eup %2185  ;;  %1657 = vst [vmem:[%s2849_s20 + $0x18] sm:$0xff] %v1625_v24 }
 0x463   : > { %v2188_v54 = vpop.eup %2187  ;;  %v1626_v28 = vmul.f32 %v2186_v18, %v2742_v36  ;;  %v1555_v57 = vpop.xlane.xlu1 %1554 }
 0x464   : > { %v1623_v29 = vmul.f32 %v2188_v54, %v2744_v41  ;;  %2197 = vrcp.f32 %v1555_v57  ;;  %v1549_v26 = vpop.xlane.xlu0 %1548 }
 0x465   : > { %1658 = vst [vmem:[%s2849_s20 + $0x20] sm:$0xff] %v1626_v28  ;;  %2199 = vrcp.f32 %v1549_v26 }
 0x466   : > { %v2190_v27 = vpop.eup %2189  ;;  %1655 = vst [vmem:[%s2849_s20 + $0x8] sm:$0xff] %v1623_v29 }
 0x467   : > { %v2192_v58 = vpop.eup %2191  ;;  %v1632_v6 = vmul.f32 %v2190_v27, %v2750_v49  ;;  %v1551_v2 = vpop.xlane.xlu1 %1550 }
 0x468   : > { %v1629_v3 = vmul.f32 %v2192_v58, %v2752_v51  ;;  %2201 = vrcp.f32 %v1551_v2  ;;  %v1545_v36 = vpop.xlane.xlu0 %1544 }
 0x469   : > { %1664 = vst [vmem:[%s2849_s20 + $0x50] sm:$0xff] %v1632_v6  ;;  %2203 = vrcp.f32 %v1545_v36 }
 0x46a   : > { %v2194_v41 = vpop.eup %2193  ;;  %1661 = vst [vmem:[%s2849_s20 + $0x38] sm:$0xff] %v1629_v3 }
 0x46b   : > { %v2196_v31 = vpop.eup %2195  ;;  %v1630_v40 = vmul.f32 %v2194_v41, %v2758_v59  ;;  %v1563_v4 = vpop.xlane.xlu1 %1562 }
 0x46c   : > { %v1627_v8 = vmul.f32 %v2196_v31, %v2760_v62  ;;  %2205 = vrcp.f32 %v1563_v4  ;;  %v1557_v49 = vpop.xlane.xlu0 %1556 }
 0x46d   : > { %1662 = vst [vmem:[%s2849_s20 + $0x40] sm:$0xff] %v1630_v40  ;;  %2207 = vrcp.f32 %v1557_v49 }
 0x46e   : > { %v2198_v51 = vpop.eup %2197  ;;  %1659 = vst [vmem:[%s2849_s20 + $0x28] sm:$0xff] %v1627_v8 }
 0x46f   : > { %v2200_v11 = vpop.eup %2199  ;;  %v1636_v47 = vmul.f32 %v2198_v51, %v2766_v7  ;;  %v1559_v39 = vpop.xlane.xlu1 %1558 }
 0x470   : > { %v1633_v53 = vmul.f32 %v2200_v11, %v2768_v44  ;;  %2209 = vrcp.f32 %v1559_v39  ;;  %v1553_v59 = vpop.xlane.xlu0 %1552 }
 0x471   : > { %1668 = vst [vmem:[%s2849_s20 + $0x70] sm:$0xff] %v1636_v47  ;;  %2211 = vrcp.f32 %v1553_v59 }
 0x472   : > { %v2202_v62 = vpop.eup %2201  ;;  %1665 = vst [vmem:[%s2849_s20 + $0x58] sm:$0xff] %v1633_v53 }
 0x473   : > { %v2204_v17 = vpop.eup %2203  ;;  %v1634_v20 = vmul.f32 %v2202_v62, %v2774_v12  ;;  %v1571_v16 = vpop.xlane.xlu1 %1570 }
 0x474   : > { %v1631_v56 = vmul.f32 %v2204_v17, %v2776_v15  ;;  %2213 = vrcp.f32 %v1571_v16  ;;  %v1565_v7 = vpop.xlane.xlu0 %1564 }
 0x475   : > { %1666 = vst [vmem:[%s2849_s20 + $0x60] sm:$0xff] %v1634_v20  ;;  %2215 = vrcp.f32 %v1565_v7 }
 0x476   : > { %v2206_v44 = vpop.eup %2205  ;;  %1663 = vst [vmem:[%s2849_s20 + $0x48] sm:$0xff] %v1631_v56 }
 0x477   : > { %v2208_v55 = vpop.eup %2207  ;;  %v1640_v30 = vmul.f32 %v2206_v44, %v2782_v23  ;;  %v1567_v21 = vpop.xlane.xlu1 %1566 }
 0x478   : > { %v1637_v32 = vmul.f32 %v2208_v55, %v2784_v50  ;;  %2217 = vrcp.f32 %v1567_v21  ;;  %v1561_v12 = vpop.xlane.xlu0 %1560 }
 0x479   : > { %1672 = vst [vmem:[%s2849_s20 + $0x90] sm:$0xff] %v1640_v30  ;;  %2219 = vrcp.f32 %v1561_v12 }
 0x47a   : > { %v2210_v15 = vpop.eup %2209  ;;  %1669 = vst [vmem:[%s2849_s20 + $0x78] sm:$0xff] %v1637_v32 }
 0x47b   : > { %v2212_v22 = vpop.eup %2211  ;;  %v1638_v61 = vmul.f32 %v2210_v15, %v2790_v60  ;;  %v1579_v42 = vpop.xlane.xlu1 %1578 }
 0x47c   : > { %v1635_v52 = vmul.f32 %v2212_v22, %v2792_v34  ;;  %2221 = vrcp.f32 %v1579_v42  ;;  %v1573_v23 = vpop.xlane.xlu0 %1572 }
 0x47d   : > { %1670 = vst [vmem:[%s2849_s20 + $0x80] sm:$0xff] %v1638_v61  ;;  %2223 = vrcp.f32 %v1573_v23 }
 0x47e   : > { %v2214_v50 = vpop.eup %2213  ;;  %1667 = vst [vmem:[%s2849_s20 + $0x68] sm:$0xff] %v1635_v52 }
 0x47f   : > { %v2216_v25 = vpop.eup %2215  ;;  %v1644_v10 = vmul.f32 %v2214_v50, %v2798_v0  ;;  %v1575_v45 = vpop.xlane.xlu1 %1574 }
 0x480   : > { %v1641_v24 = vmul.f32 %v2216_v25, %v2800_v48  ;;  %2225 = vrcp.f32 %v1575_v45  ;;  %v1569_v60 = vpop.xlane.xlu0 %1568 }
 0x481   : > { %1676 = vst [vmem:[%s2849_s20 + $0xb0] sm:$0xff] %v1644_v10  ;;  %2227 = vrcp.f32 %v1569_v60 }
 0x482   : > { %v2218_v34 = vpop.eup %2217  ;;  %1673 = vst [vmem:[%s2849_s20 + $0x98] sm:$0xff] %v1641_v24 }
 0x483   : > { %v2220_v63 = vpop.eup %2219  ;;  %v1642_v18 = vmul.f32 %v2218_v34, %v2806_v38 }
 0x484   : > { %v1639_v54 = vmul.f32 %v2220_v63, %v2808_v5  ;;  %v1581_v28 = vpop.xlane.xlu0 %1580  ;;  %v1583_v57 = vpop.xlane.xlu1 %1582 }
 0x485   : > { %1674 = vst [vmem:[%s2849_s20 + $0xa0] sm:$0xff] %v1642_v18  ;;  %2229 = vrcp.f32 %v1581_v28 }
 0x486   : > { %v2222_v0 = vpop.eup %2221  ;;  %1671 = vst [vmem:[%s2849_s20 + $0x88] sm:$0xff] %v1639_v54  ;;  %2231 = vrcp.f32 %v1583_v57 }
 0x487   : > { %v2224_v48 = vpop.eup %2223  ;;  %v1648_v29 = vmul.f32 %v2222_v0, %v2814_v9 }
 0x488   : > { %v1645_v26 = vmul.f32 %v2224_v48, %v2816_v33  ;;  %v1577_v27 = vpop.xlane.xlu0 %1576  ;;  %v1587_v58 = vpop.xlane.xlu1 %1586 }
 0x489   : > { %1680 = vst [vmem:[%s2849_s20 + $0xd0] sm:$0xff] %v1648_v29  ;;  %2233 = vrcp.f32 %v1577_v27 }
 0x48a   : > { %v2226_v38 = vpop.eup %2225  ;;  %1677 = vst [vmem:[%s2849_s20 + $0xb8] sm:$0xff] %v1645_v26  ;;  %2235 = vrcp.f32 %v1587_v58 }
 0x48b   : > { %v2228_v5 = vpop.eup %2227  ;;  %v1646_v6 = vmul.f32 %v2226_v38, %v2821_v46 }
 0x48c   : > { %v1643_v2 = vmul.f32 %v2228_v5, %v2823_v37  ;;  %v1585_v3 = vpop.xlane.xlu0 %1584 }
 0x48d   : > { %1678 = vst [vmem:[%s2849_s20 + $0xc0] sm:$0xff] %v1646_v6  ;;  %2237 = vrcp.f32 %v1585_v3 }
 0x48e   : > { %1675 = vst [vmem:[%s2849_s20 + $0xa8] sm:$0xff] %v1643_v2 }
 0x48f   : > { %v2230_v9 = vpop.eup %2229 }
 0x490   : > { %v2232_v33 = vpop.eup %2231  ;;  %v1649_v36 = vmul.f32 %v2230_v9, %v2827_v13  ;;  %v1589_v41 = vpop.xlane.xlu0 %1588 }
 0x491   : > { %v1650_v31 = vmul.f32 %v2232_v33, %v2829_v43  ;;  %2239 = vrcp.f32 %v1589_v41 }
 0x492   : > { %1681 = vst [vmem:[%s2849_s20 + $0xd8] sm:$0xff] %v1649_v36 }
 0x493   : > { %v2234_v46 = vpop.eup %2233  ;;  %1682 = vst [vmem:[%s2849_s20 + $0xe0] sm:$0xff] %v1650_v31 }
 0x494   : > { %v2236_v37 = vpop.eup %2235  ;;  %v1647_v40 = vmul.f32 %v2234_v46, %v2833_v35 }
 0x495   : > { %v1652_v4 = vmul.f32 %v2236_v37, %v2835_v14 }
 0x496   : > { %1679 = vst [vmem:[%s2849_s20 + $0xc8] sm:$0xff] %v1647_v40 }
 0x497   : > { %v2238_v8 = vpop.eup %2237  ;;  %1684 = vst [vmem:[%s2849_s20 + $0xf0] sm:$0xff] %v1652_v4 }
 0x498   : > { %v1651_v49 = vmul.f32 %v2238_v8, %v2839_v1 }
 0x49a   : > { %1683 = vst [vmem:[%s2849_s20 + $0xe8] sm:$0xff] %v1651_v49 }
 0x49b   : > { %v2240_v13 = vpop.eup %2239 }
 0x49c   : > { %v1653_v51 = vmul.f32 %v2240_v13, %v2842_v19 }
 0x49e   : > { %1685 = vst [vmem:[%s2849_s20 + $0xf8] sm:$0xff] %v1653_v51 }
 0x49f PF: > { %s18_s27 = sadd.s32 1, %s2247_s27  }
 0x4a0   : > { %p15_p4 = scmp.ge.s32.totalorder %s18_s27, 4  }
 0x4a2   :  { %17 = sbr.rel (!%p15_p4) target bundleno = 1 (0x1), region = 85 }

</bundles_post_ra>
